<compile_context>
chip_gen: v7x
topology: tpu7x:2x2x1
jax: 0.10.0
libtpu: 0.0.40
codegen_flags: <defaults>
</compile_context>

<pallas_src>
import jax
import jax.numpy as jnp
from jax.experimental import pallas as pl
from jax.experimental.pallas import tpu as pltpu


def dti_head_kernel(batch_ref, nodes_ref, prot_ref,
                    w1m_ref, w1p_ref, b1_ref,
                    w2_ref, b2_ref,
                    w3_ref, b3_ref,
                    out_ref,
                    pool_acc, cnt_acc):
    tile_b = out_ref.shape[0]
    tile_n = nodes_ref.shape[0]
    n_step = pl.program_id(1)

    @pl.when(n_step == 0)
    def _init():
        pool_acc[...] = jnp.zeros_like(pool_acc)
        cnt_acc[...] = jnp.zeros_like(cnt_acc)

    # ---- global mean pool: segment-sum of this node block -------------------
    # One-hot match of node->graph index against the rows of this batch tile.
    row0 = pl.program_id(0) * tile_b
    row_ids = row0 + jax.lax.broadcasted_iota(jnp.int32, (tile_b, tile_n), 0)
    match = row_ids == batch_ref[...]                        # [tile_b, tile_n]
    onehot = match.astype(jnp.bfloat16)                      # 0/1 exact in bf16
    pool_acc[...] += jnp.dot(onehot, nodes_ref[...],         # bf16 x bf16, f32 acc
                             preferred_element_type=jnp.float32)
    cnt_acc[...] += jnp.sum(match.astype(jnp.float32), axis=-1, keepdims=True)

    # ---- MLP head, only on the final node block ------------------------------
    @pl.when(n_step == pl.num_programs(1) - 1)
    def _finalize():
        counts = jnp.maximum(cnt_acc[...], 1.0)
        mol_rep = pool_acc[...] / counts                      # exact mean

        # concat([mol, prot]) @ W1 as a split matmul (no lane concat);
        # bf16 activations x bf16 weights, f32 accumulation, f32 bias.
        h1 = (jnp.dot(mol_rep.astype(jnp.bfloat16), w1m_ref[...],
                      preferred_element_type=jnp.float32)
              + jnp.dot(prot_ref[...].astype(jnp.bfloat16), w1p_ref[...],
                        preferred_element_type=jnp.float32)
              + b1_ref[...])
        h1 = jnp.maximum(h1, 0.0)             # ReLU; dropout = identity (eval)

        h2 = jnp.dot(h1.astype(jnp.bfloat16), w2_ref[...],
                     preferred_element_type=jnp.float32) + b2_ref[...]
        h2 = jnp.maximum(h2, 0.0)             # ReLU; dropout = identity (eval)

        # output layer (bf16 weights, lane-padded to 128 cols; wrapper slices).
        out_ref[...] = (jnp.dot(h2.astype(jnp.bfloat16), w3_ref[...],
                                preferred_element_type=jnp.float32)
                        + b3_ref[...])


def molecule_protein_forward(batch_idx, mol_nodes, prot_rep, params,
                             output_dim, tile_b=None, tile_n=None):
    """batch_idx: [1, N] int32 graph id per node (in [0, B)),
       mol_nodes: [N, Dm] f32, prot_rep: [B, Dp] f32."""
    w1m, w1p, b1, w2, b2, w3, b3 = params
    N, Dm = mol_nodes.shape
    B, Dp = prot_rep.shape
    out_pad = w3.shape[1]

    # Batch-row tile: whole batch in one grid step when small; never < 16 rows
    # (bf16 sublane packing), always a multiple of 8; 128 rows for large B.
    if tile_b is None:
        tile_b = B if B <= 256 else 128
    tile_b = max(16, pl.cdiv(tile_b, 8) * 8)
    Bp = pl.cdiv(B, tile_b) * tile_b
    if Bp != B:
        prot_rep = jnp.pad(prot_rep, ((0, Bp - B), (0, 0)))

    # Node tile: multiple of 128 (lane dim of the graph-index block).
    if tile_n is None:
        tile_n = min(512, pl.cdiv(N, 128) * 128)
    Np = pl.cdiv(N, tile_n) * tile_n
    nodes = mol_nodes.astype(jnp.bfloat16)               # bf16 node features
    if Np != N:
        nodes = jnp.pad(nodes, ((0, Np - N), (0, 0)))
        batch_idx = jnp.pad(batch_idx, ((0, 0), (0, Np - N)),
                            constant_values=-1)          # padding matches no graph

    nb, nn = Bp // tile_b, Np // tile_n
    grid = (nb, nn)                                      # reduction (node) axis last

    const = lambda b, n: (0, 0)
    resident = dict(index_map=const, pipeline_mode=pl.Buffered(1))
    in_specs = [
        pl.BlockSpec((1, tile_n), lambda b, n: (0, n)),       # graph idx per node
        pl.BlockSpec((tile_n, Dm), lambda b, n: (n, 0)),      # node features (bf16)
        pl.BlockSpec((tile_b, Dp), lambda b, n: (b, 0)),      # protein rows
        pl.BlockSpec((Dm, 1024), **resident),                 # fc1, molecule half (bf16)
        pl.BlockSpec((Dp, 1024), **resident),                 # fc1, protein half  (bf16)
        pl.BlockSpec((1, 1024), **resident),                  # fc1 bias (f32)
        pl.BlockSpec((1024, 512), **resident),                # fc2 (bf16)
        pl.BlockSpec((1, 512), **resident),                   # fc2 bias (f32)
        pl.BlockSpec((512, out_pad), **resident),             # out (bf16, lane-padded)
        pl.BlockSpec((1, out_pad), **resident),               # out bias (f32)
    ]
    out_specs = pl.BlockSpec((tile_b, out_pad), lambda b, n: (b, 0))

    flops = 2 * (Bp * Np * Dm
                 + Bp * (Dm + Dp) * 1024
                 + Bp * 1024 * 512
                 + Bp * 512 * out_pad)
    bytes_accessed = (
        (Dm + Dp) * 1024 * 2 + 1024 * 4              # fc1 (bf16) + bias
        + 1024 * 512 * 2 + 512 * 4                   # fc2 (bf16) + bias
        + 512 * out_pad * 2 + out_pad * 4            # out (bf16) + bias
        + nb * Np * (Dm * 2 + 4)                     # nodes (bf16) + graph idx
        + Bp * Dp * 4 + Bp * out_pad * 4)            # protein + output

    # Megacore split only pays off when each core gets several batch tiles.
    sem = ("parallel" if nb >= 4 else "arbitrary", "arbitrary")

    out = pl.pallas_call(
        dti_head_kernel,
        out_shape=jax.ShapeDtypeStruct((Bp, out_pad), jnp.float32),
        grid=grid,
        in_specs=in_specs,
        out_specs=out_specs,
        scratch_shapes=[pltpu.VMEM((tile_b, Dm), jnp.float32),   # pooled sums
                        pltpu.VMEM((tile_b, 1), jnp.float32)],   # node counts
        compiler_params=pltpu.CompilerParams(
            dimension_semantics=sem,
            vmem_limit_bytes=32 * 1024 * 1024),
        cost_estimate=pl.CostEstimate(
            flops=int(flops),
            transcendentals=int(Bp),
            bytes_accessed=int(bytes_accessed)),
    )(batch_idx, nodes, prot_rep, w1m, w1p, b1, w2, b2, w3, b3)

    return out[:B, :output_dim]


def init_params(key, mol_dim, prot_dim, output_dim):
    """nn.Linear-style init: U(-1/sqrt(fan_in), 1/sqrt(fan_in)); weights [in, out].

    Returns (kernel_params, f32_params): kernel params have bf16 weights with
    fc1 split for the concat-free matmul and the out layer lane-padded to 128;
    f32_params are the un-quantized originals (for error quantification)."""
    def linear(k, fan_in, fan_out):
        kw, kb = jax.random.split(k)
        bound = 1.0 / jnp.sqrt(jnp.float32(fan_in))
        w = jax.random.uniform(kw, (fan_in, fan_out), jnp.float32, -bound, bound)
        b = jax.random.uniform(kb, (1, fan_out), jnp.float32, -bound, bound)
        return w, b

    k1, k2, k3 = jax.random.split(key, 3)
    w1, b1 = linear(k1, mol_dim + prot_dim, 1024)   # fc1
    w2, b2 = linear(k2, 1024, 512)                  # fc2
    w3, b3 = linear(k3, 512, output_dim)            # out
    f32_params = (w1, b1, w2, b2, w3, b3)

    out_pad = max(128, pl.cdiv(output_dim, 128) * 128)
    w3p = jnp.pad(w3, ((0, 0), (0, out_pad - output_dim)))
    b3p = jnp.pad(b3, ((0, 0), (0, out_pad - output_dim)))

    kernel_params = (
        w1[:mol_dim].astype(jnp.bfloat16),   # fc1 molecule half (bf16)
        w1[mol_dim:].astype(jnp.bfloat16),   # fc1 protein half  (bf16)
        b1,                                  # f32 bias
        w2.astype(jnp.bfloat16), b2,
        w3p.astype(jnp.bfloat16), b3p,
    )
    return kernel_params, f32_params


def reference_forward_f32(batch_idx, mol_nodes, prot_rep, params_f32, output_dim):
    """Pure-f32 reference matching the original PyTorch module."""
    w1, b1, w2, b2, w3, b3 = params_f32
    B = prot_rep.shape[0]
    idx = batch_idx[0]
    onehot = (jnp.arange(B)[:, None] == idx[None, :]).astype(jnp.float32)
    sums = onehot @ mol_nodes
    counts = jnp.maximum(onehot.sum(1, keepdims=True), 1.0)
    mol = sums / counts
    x = jnp.concatenate([mol, prot_rep], axis=1)
    h1 = jnp.maximum(x @ w1 + b1, 0.0)
    h2 = jnp.maximum(h1 @ w2 + b2, 0.0)
    return (h2 @ w3 + b3)[:, :output_dim]


def reference_forward_kernel_dtypes(batch_idx, mol_nodes, prot_rep, params,
                                    output_dim):
    """Pure-JAX reference mirroring the kernel's bf16-operand / f32-accum flow."""
    w1m, w1p, b1, w2, b2, w3, b3 = params
    B = prot_rep.shape[0]
    idx = batch_idx[0]
    match = jnp.arange(B)[:, None] == idx[None, :]
    onehot = match.astype(jnp.bfloat16)
    sums = jnp.dot(onehot, mol_nodes.astype(jnp.bfloat16),
                   preferred_element_type=jnp.float32)
    counts = jnp.maximum(jnp.sum(match.astype(jnp.float32), 1, keepdims=True), 1.0)
    mol = sums / counts
    h1 = (jnp.dot(mol.astype(jnp.bfloat16), w1m, preferred_element_type=jnp.float32)
          + jnp.dot(prot_rep.astype(jnp.bfloat16), w1p,
                    preferred_element_type=jnp.float32)
          + b1)
    h1 = jnp.maximum(h1, 0.0)
    h2 = jnp.dot(h1.astype(jnp.bfloat16), w2,
                 preferred_element_type=jnp.float32) + b2
    h2 = jnp.maximum(h2, 0.0)
    out = jnp.dot(h2.astype(jnp.bfloat16), w3,
                  preferred_element_type=jnp.float32) + b3
    return out[:, :output_dim]


if __name__ == "__main__":
    key = jax.random.PRNGKey(0)
    k_nodes, k_prot, k_params = jax.random.split(key, 3)

    B = 16               # (molecule, protein) pairs in the batch
    N = 24               # total molecule nodes across the batch
    mol_emb_dim = 32
    prot_emb_dim = 32
    output_dim = 1

    # Synthetic encoder outputs (stand-ins for molecule_model / protein_model).
    mol_nodes = jax.random.normal(k_nodes, (N, mol_emb_dim), jnp.float32)
    prot_rep = jax.random.normal(k_prot, (B, prot_emb_dim), jnp.float32)
    nodes_per_graph = jnp.array([2] * 8 + [1] * 8, jnp.int32)   # sums to N=24
    batch_idx = jnp.repeat(jnp.arange(B, dtype=jnp.int32),
                           nodes_per_graph).reshape(1, N)

    params, params_f32 = init_params(k_params, mol_emb_dim, prot_emb_dim,
                                     output_dim)

    out = molecule_protein_forward(batch_idx, mol_nodes, prot_rep, params,
                                   output_dim)
    out = jax.block_until_ready(out)
    assert out.shape == (B, output_dim)

    ref_k = reference_forward_kernel_dtypes(batch_idx, mol_nodes, prot_rep,
                                            params, output_dim)
    ref_f = reference_forward_f32(batch_idx, mol_nodes, prot_rep,
                                  params_f32, output_dim)
    err_k = float(jnp.max(jnp.abs(out - ref_k)))   # kernel vs same-numerics ref
    err_f = float(jnp.max(jnp.abs(out - ref_f)))   # kernel vs original f32 model
    assert err_k < 5e-3, "kernel vs bf16-mirror reference max abs err %g" % err_k
    assert err_f < 3e-2, "kernel vs f32 original-model reference max abs err %g" % err_f

    print("KERNEL_OK")
</pallas_src>

<mosaic_0001>
module attributes {stable_mosaic.version = 11 : i64} {
  func.func @dti_head_kernel(%arg0: i32, %arg1: i32, %arg2: memref<1x128xi32, #tpu.memory_space<vmem>>, %arg3: memref<128x32xbf16, #tpu.memory_space<vmem>>, %arg4: memref<16x32xf32, #tpu.memory_space<vmem>>, %arg5: memref<32x1024xbf16, #tpu.memory_space<vmem>>, %arg6: memref<32x1024xbf16, #tpu.memory_space<vmem>>, %arg7: memref<1x1024xf32, #tpu.memory_space<vmem>>, %arg8: memref<1024x512xbf16, #tpu.memory_space<vmem>>, %arg9: memref<1x512xf32, #tpu.memory_space<vmem>>, %arg10: memref<512x128xbf16, #tpu.memory_space<vmem>>, %arg11: memref<1x128xf32, #tpu.memory_space<vmem>>, %arg12: memref<16x128xf32, #tpu.memory_space<vmem>>, %arg13: memref<16x32xf32, #tpu.memory_space<vmem>>, %arg14: memref<16x1xf32, #tpu.memory_space<vmem>>) attributes {dimension_semantics = [#tpu.dimension_semantics<arbitrary>, #tpu.dimension_semantics<arbitrary>], iteration_bounds = array<i64: 1, 1>, scalar_prefetch = 0 : i64, scratch_operands = 2 : i64, tpu.core_type = #tpu.core_type<tc>, window_params = [{transform_indices = @transform_0, window_bounds = array<i64: 1, 128>}, {transform_indices = @transform_1, window_bounds = array<i64: 128, 32>}, {transform_indices = @transform_2, window_bounds = array<i64: 16, 32>}, {pipeline_mode = #tpu.pipeline_mode<synchronous>, transform_indices = @transform_3, window_bounds = array<i64: 32, 1024>}, {pipeline_mode = #tpu.pipeline_mode<synchronous>, transform_indices = @transform_4, window_bounds = array<i64: 32, 1024>}, {pipeline_mode = #tpu.pipeline_mode<synchronous>, transform_indices = @transform_5, window_bounds = array<i64: 1, 1024>}, {pipeline_mode = #tpu.pipeline_mode<synchronous>, transform_indices = @transform_6, window_bounds = array<i64: 1024, 512>}, {pipeline_mode = #tpu.pipeline_mode<synchronous>, transform_indices = @transform_7, window_bounds = array<i64: 1, 512>}, {pipeline_mode = #tpu.pipeline_mode<synchronous>, transform_indices = @transform_8, window_bounds = array<i64: 512, 128>}, {pipeline_mode = #tpu.pipeline_mode<synchronous>, transform_indices = @transform_9, window_bounds = array<i64: 1, 128>}, {transform_indices = @transform_10, window_bounds = array<i64: 16, 128>}]} {
    %c0_i32 = arith.constant 0 : i32
    %0 = arith.cmpi eq, %arg1, %c0_i32 : i32
    %1 = arith.extui %0 : i1 to i32
    %c0_i32_0 = arith.constant 0 : i32
    %2 = arith.cmpi ne, %1, %c0_i32_0 : i32
    scf.if %2 {
      %cst_15 = arith.constant 0.000000e+00 : f32
      %28 = vector.broadcast %cst_15 : f32 to vector<16x32xf32>
      %c0_16 = arith.constant 0 : index
      %c0_17 = arith.constant 0 : index
      %29 = vector.load %arg13[%c0_16, %c0_17] : memref<16x32xf32, #tpu.memory_space<vmem>>, vector<16x32xf32>
      tpu.vector_store %arg13[%c0_16, %c0_17], %28 {strides = array<i32>} : memref<16x32xf32, #tpu.memory_space<vmem>>, vector<16x32xf32>,
      %cst_18 = arith.constant 0.000000e+00 : f32
      %30 = vector.broadcast %cst_18 : f32 to vector<16x1xf32>
      %c0_19 = arith.constant 0 : index
      %c0_20 = arith.constant 0 : index
      %31 = vector.load %arg14[%c0_19, %c0_20] : memref<16x1xf32, #tpu.memory_space<vmem>>, vector<16x1xf32>
      tpu.vector_store %arg14[%c0_19, %c0_20], %30 {strides = array<i32>} : memref<16x1xf32, #tpu.memory_space<vmem>>, vector<16x1xf32>,
    } else {
    }
    %c16_i32 = arith.constant 16 : i32
    %3 = arith.muli %arg0, %c16_i32 : i32
    %4 = tpu.iota {dimensions = array<i32: 0>} : vector<16x128xi32>
    %5 = vector.broadcast %3 : i32 to vector<16x128xi32>
    %6 = arith.addi %5, %4 : vector<16x128xi32>
    %c0 = arith.constant 0 : index
    %c0_1 = arith.constant 0 : index
    %7 = vector.load %arg2[%c0, %c0_1] : memref<1x128xi32, #tpu.memory_space<vmem>>, vector<1x128xi32>
    %8 = vector.broadcast %7 : vector<1x128xi32> to vector<16x128xi32>
    %9 = arith.cmpi eq, %6, %8 : vector<16x128xi32>
    %10 = arith.extui %9 : vector<16x128xi1> to vector<16x128xi32>
    %11 = arith.sitofp %10 : vector<16x128xi32> to vector<16x128xf32>
    %12 = arith.truncf %11 : vector<16x128xf32> to vector<16x128xbf16>
    %c0_2 = arith.constant 0 : index
    %c0_3 = arith.constant 0 : index
    %13 = vector.load %arg13[%c0_2, %c0_3] : memref<16x32xf32, #tpu.memory_space<vmem>>, vector<16x32xf32>
    %c0_4 = arith.constant 0 : index
    %c0_5 = arith.constant 0 : index
    %14 = vector.load %arg3[%c0_4, %c0_5] : memref<128x32xbf16, #tpu.memory_space<vmem>>, vector<128x32xbf16>
    %cst = arith.constant dense<0.000000e+00> : vector<16x32xf32>
    %15 = tpu.matmul %12, %14, %cst {dimension_numbers = #tpu.dot_dimension_numbers<[1], [0], [0], [1], [0, 0, 1, 1], [], []>} : vector<16x128xbf16>, vector<128x32xbf16>, vector<16x32xf32> -> vector<16x32xf32>
    %16 = arith.addf %13, %15 : vector<16x32xf32>
    %c0_6 = arith.constant 0 : index
    %c0_7 = arith.constant 0 : index
    %17 = vector.load %arg13[%c0_6, %c0_7] : memref<16x32xf32, #tpu.memory_space<vmem>>, vector<16x32xf32>
    tpu.vector_store %arg13[%c0_6, %c0_7], %16 {strides = array<i32>} : memref<16x32xf32, #tpu.memory_space<vmem>>, vector<16x32xf32>,
    %c0_8 = arith.constant 0 : index
    %c0_9 = arith.constant 0 : index
    %18 = vector.load %arg14[%c0_8, %c0_9] : memref<16x1xf32, #tpu.memory_space<vmem>>, vector<16x1xf32>
    %19 = arith.extui %9 : vector<16x128xi1> to vector<16x128xi32>
    %20 = arith.sitofp %19 : vector<16x128xi32> to vector<16x128xf32>
    %cst_10 = arith.constant dense<0.000000e+00> : vector<16xf32>
    %21 = vector.multi_reduction <add>, %20, %cst_10 [1] : vector<16x128xf32> to vector<16xf32>
    %22 = vector.shape_cast %21 : vector<16xf32> to vector<16x1xf32>
    %23 = arith.addf %18, %22 : vector<16x1xf32>
    %c0_11 = arith.constant 0 : index
    %c0_12 = arith.constant 0 : index
    %24 = vector.load %arg14[%c0_11, %c0_12] : memref<16x1xf32, #tpu.memory_space<vmem>>, vector<16x1xf32>
    tpu.vector_store %arg14[%c0_11, %c0_12], %23 {strides = array<i32>} : memref<16x1xf32, #tpu.memory_space<vmem>>, vector<16x1xf32>,
    %c0_i32_13 = arith.constant 0 : i32
    %25 = arith.cmpi eq, %arg1, %c0_i32_13 : i32
    %26 = arith.extui %25 : i1 to i32
    %c0_i32_14 = arith.constant 0 : i32
    %27 = arith.cmpi ne, %26, %c0_i32_14 : i32
    scf.if %27 {
      %c0_15 = arith.constant 0 : index
      %c0_16 = arith.constant 0 : index
      %28 = vector.load %arg14[%c0_15, %c0_16] : memref<16x1xf32, #tpu.memory_space<vmem>>, vector<16x1xf32>
      %cst_17 = arith.constant 1.000000e+00 : f32
      %29 = vector.broadcast %cst_17 : f32 to vector<16x1xf32>
      %30 = arith.maximumf %28, %29 : vector<16x1xf32>
      %c0_18 = arith.constant 0 : index
      %c0_19 = arith.constant 0 : index
      %31 = vector.load %arg13[%c0_18, %c0_19] : memref<16x32xf32, #tpu.memory_space<vmem>>, vector<16x32xf32>
      %32 = vector.broadcast %30 : vector<16x1xf32> to vector<16x32xf32>
      %33 = arith.divf %31, %32 : vector<16x32xf32>
      %34 = arith.truncf %33 : vector<16x32xf32> to vector<16x32xbf16>
      %c0_20 = arith.constant 0 : index
      %c0_21 = arith.constant 0 : index
      %35 = vector.load %arg5[%c0_20, %c0_21] : memref<32x1024xbf16, #tpu.memory_space<vmem>>, vector<32x1024xbf16>
      %cst_22 = arith.constant dense<0.000000e+00> : vector<16x1024xf32>
      %36 = tpu.matmul %34, %35, %cst_22 {dimension_numbers = #tpu.dot_dimension_numbers<[1], [0], [0], [1], [0, 0, 1, 1], [], []>} : vector<16x32xbf16>, vector<32x1024xbf16>, vector<16x1024xf32> -> vector<16x1024xf32>
      %c0_23 = arith.constant 0 : index
      %c0_24 = arith.constant 0 : index
      %37 = vector.load %arg4[%c0_23, %c0_24] : memref<16x32xf32, #tpu.memory_space<vmem>>, vector<16x32xf32>
      %38 = arith.truncf %37 : vector<16x32xf32> to vector<16x32xbf16>
      %c0_25 = arith.constant 0 : index
      %c0_26 = arith.constant 0 : index
      %39 = vector.load %arg6[%c0_25, %c0_26] : memref<32x1024xbf16, #tpu.memory_space<vmem>>, vector<32x1024xbf16>
      %cst_27 = arith.constant dense<0.000000e+00> : vector<16x1024xf32>
      %40 = tpu.matmul %38, %39, %cst_27 {dimension_numbers = #tpu.dot_dimension_numbers<[1], [0], [0], [1], [0, 0, 1, 1], [], []>} : vector<16x32xbf16>, vector<32x1024xbf16>, vector<16x1024xf32> -> vector<16x1024xf32>
      %41 = arith.addf %36, %40 : vector<16x1024xf32>
      %c0_28 = arith.constant 0 : index
      %c0_29 = arith.constant 0 : index
      %42 = vector.load %arg7[%c0_28, %c0_29] : memref<1x1024xf32, #tpu.memory_space<vmem>>, vector<1x1024xf32>
      %43 = vector.broadcast %42 : vector<1x1024xf32> to vector<16x1024xf32>
      %44 = arith.addf %41, %43 : vector<16x1024xf32>
      %cst_30 = arith.constant 0.000000e+00 : f32
      %45 = vector.broadcast %cst_30 : f32 to vector<16x1024xf32>
      %46 = arith.maximumf %44, %45 : vector<16x1024xf32>
      %47 = arith.truncf %46 : vector<16x1024xf32> to vector<16x1024xbf16>
      %c0_31 = arith.constant 0 : index
      %c0_32 = arith.constant 0 : index
      %48 = vector.load %arg8[%c0_31, %c0_32] : memref<1024x512xbf16, #tpu.memory_space<vmem>>, vector<1024x512xbf16>
      %cst_33 = arith.constant dense<0.000000e+00> : vector<16x512xf32>
      %49 = tpu.matmul %47, %48, %cst_33 {dimension_numbers = #tpu.dot_dimension_numbers<[1], [0], [0], [1], [0, 0, 1, 1], [], []>} : vector<16x1024xbf16>, vector<1024x512xbf16>, vector<16x512xf32> -> vector<16x512xf32>
      %c0_34 = arith.constant 0 : index
      %c0_35 = arith.constant 0 : index
      %50 = vector.load %arg9[%c0_34, %c0_35] : memref<1x512xf32, #tpu.memory_space<vmem>>, vector<1x512xf32>
      %51 = vector.broadcast %50 : vector<1x512xf32> to vector<16x512xf32>
      %52 = arith.addf %49, %51 : vector<16x512xf32>
      %cst_36 = arith.constant 0.000000e+00 : f32
      %53 = vector.broadcast %cst_36 : f32 to vector<16x512xf32>
      %54 = arith.maximumf %52, %53 : vector<16x512xf32>
      %55 = arith.truncf %54 : vector<16x512xf32> to vector<16x512xbf16>
      %c0_37 = arith.constant 0 : index
      %c0_38 = arith.constant 0 : index
      %56 = vector.load %arg10[%c0_37, %c0_38] : memref<512x128xbf16, #tpu.memory_space<vmem>>, vector<512x128xbf16>
      %cst_39 = arith.constant dense<0.000000e+00> : vector<16x128xf32>
      %57 = tpu.matmul %55, %56, %cst_39 {dimension_numbers = #tpu.dot_dimension_numbers<[1], [0], [0], [1], [0, 0, 1, 1], [], []>} : vector<16x512xbf16>, vector<512x128xbf16>, vector<16x128xf32> -> vector<16x128xf32>
      %c0_40 = arith.constant 0 : index
      %c0_41 = arith.constant 0 : index
      %58 = vector.load %arg11[%c0_40, %c0_41] : memref<1x128xf32, #tpu.memory_space<vmem>>, vector<1x128xf32>
      %59 = vector.broadcast %58 : vector<1x128xf32> to vector<16x128xf32>
      %60 = arith.addf %57, %59 : vector<16x128xf32>
      %c0_42 = arith.constant 0 : index
      %c0_43 = arith.constant 0 : index
      %61 = vector.load %arg12[%c0_42, %c0_43] : memref<16x128xf32, #tpu.memory_space<vmem>>, vector<16x128xf32>
      tpu.vector_store %arg12[%c0_42, %c0_43], %60 {strides = array<i32>} : memref<16x128xf32, #tpu.memory_space<vmem>>, vector<16x128xf32>,
    } else {
    }
    return
  }
  func.func @transform_0(%arg0: i32, %arg1: i32) -> (i32, i32) {
    %c0_i32 = arith.constant 0 : i32
    %c0_i32_0 = arith.constant 0 : i32
    return %c0_i32, %arg1 : i32, i32
  }
  func.func @transform_1(%arg0: i32, %arg1: i32) -> (i32, i32) {
    %c0_i32 = arith.constant 0 : i32
    %c0_i32_0 = arith.constant 0 : i32
    return %arg1, %c0_i32 : i32, i32
  }
  func.func @transform_2(%arg0: i32, %arg1: i32) -> (i32, i32) {
    %c0_i32 = arith.constant 0 : i32
    %c0_i32_0 = arith.constant 0 : i32
    return %arg0, %c0_i32 : i32, i32
  }
  func.func @transform_3(%arg0: i32, %arg1: i32) -> (i32, i32) {
    %c0_i32 = arith.constant 0 : i32
    %c0_i32_0 = arith.constant 0 : i32
    %c0_i32_1 = arith.constant 0 : i32
    return %c0_i32, %c0_i32_0 : i32, i32
  }
  func.func @transform_4(%arg0: i32, %arg1: i32) -> (i32, i32) {
    %c0_i32 = arith.constant 0 : i32
    %c0_i32_0 = arith.constant 0 : i32
    %c0_i32_1 = arith.constant 0 : i32
    return %c0_i32, %c0_i32_0 : i32, i32
  }
  func.func @transform_5(%arg0: i32, %arg1: i32) -> (i32, i32) {
    %c0_i32 = arith.constant 0 : i32
    %c0_i32_0 = arith.constant 0 : i32
    %c0_i32_1 = arith.constant 0 : i32
    return %c0_i32, %c0_i32_0 : i32, i32
  }
  func.func @transform_6(%arg0: i32, %arg1: i32) -> (i32, i32) {
    %c0_i32 = arith.constant 0 : i32
    %c0_i32_0 = arith.constant 0 : i32
    %c0_i32_1 = arith.constant 0 : i32
    return %c0_i32, %c0_i32_0 : i32, i32
  }
  func.func @transform_7(%arg0: i32, %arg1: i32) -> (i32, i32) {
    %c0_i32 = arith.constant 0 : i32
    %c0_i32_0 = arith.constant 0 : i32
    %c0_i32_1 = arith.constant 0 : i32
    return %c0_i32, %c0_i32_0 : i32, i32
  }
  func.func @transform_8(%arg0: i32, %arg1: i32) -> (i32, i32) {
    %c0_i32 = arith.constant 0 : i32
    %c0_i32_0 = arith.constant 0 : i32
    %c0_i32_1 = arith.constant 0 : i32
    return %c0_i32, %c0_i32_0 : i32, i32
  }
  func.func @transform_9(%arg0: i32, %arg1: i32) -> (i32, i32) {
    %c0_i32 = arith.constant 0 : i32
    %c0_i32_0 = arith.constant 0 : i32
    %c0_i32_1 = arith.constant 0 : i32
    return %c0_i32, %c0_i32_0 : i32, i32
  }
  func.func @transform_10(%arg0: i32, %arg1: i32) -> (i32, i32) {
    %c0_i32 = arith.constant 0 : i32
    %c0_i32_0 = arith.constant 0 : i32
    return %arg0, %c0_i32 : i32, i32
  }
}

</mosaic_0001>

<bundles_post_ra>
// kernel: tpu_custom_call.1
= control target key start
LH: loop header
LB: loop body
LE: loop exit
PB: predicated region body
PF: predicated region fallthrough
CT: control target
= control target key end

     0   :  { %15 = vsyncpa [#allocation5], 0  ;;  %s4491_s0 = inlined_call_operand.vmem [shape: s32[1,128], index: 0, kind: input, shape index: {}]   ;;  %s4492_s1 = inlined_call_operand.vmem [shape: bf16[128,32], index: 1, kind: input, shape index: {}]   ;;  %s4493_s2 = inlined_call_operand.vmem [shape: f32[16,32], index: 2, kind: input, shape index: {}]   ;;  %s4494_s3 = inlined_call_operand.hbm [shape: bf16[32,1024], index: 3, kind: input, shape index: {}]   ;;  %s4495_s4 = inlined_call_operand.hbm [shape: bf16[32,1024], index: 4, kind: input, shape index: {}]   ;;  %s4496_s5 = inlined_call_operand.vmem [shape: f32[1,1024], index: 5, kind: input, shape index: {}]   ;;  %s4497_s6 = inlined_call_operand.hbm [shape: bf16[1024,512], index: 6, kind: input, shape index: {}]   ;;  %s4498_s7 = inlined_call_operand.vmem [shape: f32[1,512], index: 7, kind: input, shape index: {}]   ;;  %s4499_s8 = inlined_call_operand.hbm [shape: bf16[512,128], index: 8, kind: input, shape index: {}]   ;;  %s4500_s9 = inlined_call_operand.vmem [shape: f32[1,128], index: 9, kind: input, shape index: {}]   ;;  %s4501_s10 = inlined_call_operand.hbm [shape: f32[16,128], index: 10, kind: output, shape index: {}]  }
   0x1   :  { %16 = vsyncpa [#allocation8], 0 }
   0x2   :  { %17 = vsyncpa [#allocation11], 0 }
   0x3   :  { %18 = vsyncpa [#allocation6], 0  ;;  %s4203_s13 = smov [#allocation7]   ;;  %s4204_s15 = smov [#allocation4]  }
   0x4   :  { %s42_s14 = sshll.u32 %s4203_s13, 4  ;;  %s30_s16 = sshll.u32 %s4204_s15, 4  ;;  %s43_s14 = int_to_ptr.vmem [resolvable:$true] %s42_s14  ;;  %s4275_s16 = int_to_ptr.vmem [resolvable:$true] %s30_s16 }
   0x5   :  { %s4085_s19 = scalar_lea.hbm %s4495_s4, 2048 }
   0x6   :  { %p4086_p0 = scmp.ne.s32.totalorder %s4495_s4, %s4085_s19  ;;  %p4089_p1 = scmp.lt.u32.totalorder %s4085_s19, %s4495_s4 }
   0x8   :  { %p4091_p2 = pnand %p4089_p1, %p4086_p0 }
   0xa   :  { %4094 = shalt.err (!%p4091_p2)
}
   0xb   :  { %s4095_s24 = scalar_lea.vmem %s43_s14, 2048  ;;  %p4100_p4 = scmp.lt.s32.totalorder %s43_s14, %s43_s14 }
   0xc   :  { %p4096_p3 = scmp.ne.s32.totalorder %s43_s14, %s4095_s24  ;;  %p4101_p5 = scmp.lt.s32.totalorder %s4095_s24, %s4095_s24 }
   0xe   :  { %p4102_p6 = por %p4101_p5, %p4100_p4 }
  0x10   :  { %p4103_p7 = pnand %p4102_p6, %p4096_p3 }
  0x12   :  { %4106 = shalt.err (!%p4103_p7)
}
  0x13   :  { %s4205_s25 = smov 512   ;;  %s4206_s26 = smov 32  }
  0x14   :  { %48 = dma.hbm_to_vmem [thread:$0]  %s4495_s4, 2048, %s43_s14, [#allocation8], %s4205_s25, %s4205_s25, %s4206_s26  }
  0x15   :  { %s4107_s11 = scalar_lea.hbm %s4494_s3, 2048 }
  0x16   :  { %p4108_p8 = scmp.ne.s32.totalorder %s4494_s3, %s4107_s11  ;;  %p4111_p9 = scmp.lt.u32.totalorder %s4107_s11, %s4494_s3 }
  0x18   :  { %p4113_p10 = pnand %p4111_p9, %p4108_p8 }
  0x1a   :  { %4116 = shalt.err (!%p4113_p10)
}
  0x1b   :  { %s4117_s18 = scalar_lea.vmem %s4275_s16, 2048  ;;  %p4122_p12 = scmp.lt.s32.totalorder %s4275_s16, %s4275_s16 }
  0x1c   :  { %p4118_p11 = scmp.ne.s32.totalorder %s4275_s16, %s4117_s18  ;;  %p4123_p13 = scmp.lt.s32.totalorder %s4117_s18, %s4117_s18 }
  0x1e   :  { %p4124_p0 = por %p4123_p13, %p4122_p12 }
  0x20   :  { %p4125_p1 = pnand %p4124_p0, %p4118_p11 }
  0x22   :  { %4128 = shalt.err (!%p4125_p1)
}
  0x23   :  { %36 = dma.hbm_to_vmem [thread:$0]  %s4494_s3, 2048, %s4275_s16, [#allocation5], %s4205_s25, %s4205_s25, %s4206_s26  }
  0x24   :  { %s4207_s19 = smov [#allocation9]   ;;  %s4129_s23 = scalar_lea.hbm %s4497_s6, 32768 }
  0x25   :  { %s56_s20 = sshll.u32 %s4207_s19, 4  ;;  %p4130_p2 = scmp.ne.s32.totalorder %s4497_s6, %s4129_s23  ;;  %s57_s20 = int_to_ptr.vmem [resolvable:$true] %s56_s20 }
  0x26   :  { %p4133_p3 = scmp.lt.u32.totalorder %s4129_s23, %s4497_s6 }
  0x28   :  { %p4135_p4 = pnand %p4133_p3, %p4130_p2 }
  0x2a   :  { %4138 = shalt.err (!%p4135_p4)
}
  0x2b   :  { %s4139_s30 = scalar_lea.vmem %s57_s20, 32768  ;;  %p4144_p6 = scmp.lt.s32.totalorder %s57_s20, %s57_s20 }
  0x2c   :  { %p4140_p5 = scmp.ne.s32.totalorder %s57_s20, %s4139_s30  ;;  %p4145_p7 = scmp.lt.s32.totalorder %s4139_s30, %s4139_s30 }
  0x2e   :  { %p4146_p8 = por %p4145_p7, %p4144_p6 }
  0x30   :  { %p4147_p9 = pnand %p4146_p8, %p4140_p5 }
  0x32   :  { %4150 = shalt.err (!%p4147_p9)
}
  0x33   :  { %s4208_s3 = smov 256   ;;  %s4209_s16 = smov 16  }
  0x34   :  { %62 = dma.hbm_to_vmem [thread:$0]  %s4497_s6, 32768, %s57_s20, [#allocation8], %s4208_s3, %s4208_s3, %s4209_s16  }
  0x35   :  { %s4210_s11 = smov [#allocation10]   ;;  %s4151_s17 = scalar_lea.hbm %s4499_s8, 4096 }
  0x36   :  { %s70_s12 = sshll.u32 %s4210_s11, 4  ;;  %p4152_p10 = scmp.ne.s32.totalorder %s4499_s8, %s4151_s17  ;;  %s71_s12 = int_to_ptr.vmem [resolvable:$true] %s70_s12 }
  0x37   :  { %p4155_p11 = scmp.lt.u32.totalorder %s4151_s17, %s4499_s8 }
  0x39   :  { %p4157_p12 = pnand %p4155_p11, %p4152_p10 }
  0x3b   :  { %4160 = shalt.err (!%p4157_p12)
}
  0x3c   :  { %s4161_s21 = scalar_lea.vmem %s71_s12, 4096  ;;  %p4166_p0 = scmp.lt.s32.totalorder %s71_s12, %s71_s12 }
  0x3d   :  { %p4162_p13 = scmp.ne.s32.totalorder %s71_s12, %s4161_s21  ;;  %p4167_p1 = scmp.lt.s32.totalorder %s4161_s21, %s4161_s21 }
  0x3f   :  { %p4168_p2 = por %p4167_p1, %p4166_p0 }
  0x41   :  { %p4169_p3 = pnand %p4168_p2, %p4162_p13 }
  0x43   :  { %4172 = shalt.err (!%p4169_p3)
}
  0x44   :  { %s4211_s6 = smov 64   ;;  %s4212_s20 = smov 4  }
  0x45   :  { %76 = dma.hbm_to_vmem [thread:$0]  %s4499_s8, 4096, %s71_s12, [#allocation11], %s4211_s6, %s4211_s6, %s4212_s20  }
  0x46   :  { %4195 = dma.done.wait [#allocation5], 2048  }
  0x47   :  { %4196 = vsyncadd [#allocation5], 4294965248 }
  0x48   :  { %4197 = dma.done.wait [#allocation8], 34816  }
  0x49   :  { %4198 = vsyncadd [#allocation8], 4294932480 }
  0x4a   :  { %4199 = dma.done.wait [#allocation11], 4096  }
  0x4b   :  { %4200 = vsyncadd [#allocation11], 4294963200  ;;  %v103_v0 = vlaneseq  ;;  %v4213_v1 = vmov 0.0   ;;  %vm4214_vm0 = vmmov 0   ;;  %vm99_vm1 = vcmask 7168   ;;  %v3657_v5 = vld [vmem:[%s4492_s1] sm:$0xff]  }
  0x4c   :  { %3570 = vmatprep.subr.bf16.mxu0 %v4213_v1  ;;  %3586 = vmatprep.mubr.msk.bf16.mxu0 %vm4214_vm0, %v4213_v1  ;;  %100 = vst.msk [vmem:[#allocation3] sm:$0xff] %vm99_vm1, %v4213_v1  ;;  %101 = vst.msk [vmem:[#allocation3 + $0x8] sm:$0xff] %vm99_vm1, %v4213_v1  ;;  %v3175_v4 = vld [vmem:[%s4491_s0] ss:$0 sm:$0xff]  ;;  %v3658_v7 = vld [vmem:[%s4492_s1 + $0x8] sm:$0xff]   ;;  %v4215_v15 = vmov 0  }
  0x4d   :  { %v4330_v2 = vshrl.u32 %v103_v0, 7  ;;  %3571 = vmatpush3.bf16.msra.mxu0 %v3657_v5  ;;  %v3659_v9 = vld [vmem:[%s4492_s1 + $0x10] sm:$0xff]   ;;  %v3660_v10 = vld [vmem:[%s4492_s1 + $0x18] sm:$0xff]   ;;  %v3661_v11 = vld [vmem:[%s4492_s1 + $0x20] sm:$0xff]   ;;  %3655 = vset.pattern.permute.xlu1 %v4215_v15  ;;  %vm96_vm5 = vcmask 261120   ;;  %s4217_s23 = smov [#allocation12]  }
  0x4e   :  { %3572 = vmatprep.subr.bf16.mxu0 %v4213_v1  ;;  %v3662_v12 = vld [vmem:[%s4492_s1 + $0x28] sm:$0xff]   ;;  %v3663_v13 = vld [vmem:[%s4492_s1 + $0x30] sm:$0xff]   ;;  %v3664_v16 = vld [vmem:[%s4492_s1 + $0x38] sm:$0xff]   ;;  %418 = vmatprep.mubr.bf16.mxu1 %v4215_v15  ;;  %v4216_v20 = vmov 1.0|1.0   ;;  %97 = vst.msk [vmem:[#allocation2] sm:$0xff] %vm96_vm5, %v4213_v1 }
  0x4f   :  { %v105_v3 = vadd.s32 8, %v4330_v2  ;;  %vm114_vm2 = vcmp.eq.s32.totalorder %v4330_v2, %v3175_v4  ;;  %3656 = vset.pattern.permute.xlu0 %v4215_v15  ;;  %v287_v17 = vld [vmem:[#allocation7] sm:$0xff]  ;;  %98 = vst.msk [vmem:[#allocation2 + $0x8] sm:$0xff] %vm96_vm5, %v4213_v1  ;;  %v288_v25 = vld [vmem:[#allocation7 + $0x8] sm:$0xff]  ;;  %v289_v35 = vld [vmem:[#allocation7 + $0x10] sm:$0xff]  ;;  %s3161_s8 = sshll.u32 %s4217_s23, 4  ;;  %s3162_s8 = int_to_ptr.vmem [resolvable:$true] %s3161_s8 }
  0x50   :  { %v3176_v6 = vsel %vm114_vm2, 1.0, %v4213_v1  ;;  %v291_v18 = vld [vmem:[#allocation7 + $0x20] sm:$0xff]  ;;  %v292_v26 = vld [vmem:[#allocation7 + $0x28] sm:$0xff]  ;;  %v293_v36 = vld [vmem:[#allocation7 + $0x30] sm:$0xff]  ;;  %s4173_s24 = scalar_lea.vmem %s3162_s8, 256  ;;  %p4178_p5 = scmp.lt.s32.totalorder %s3162_s8, %s3162_s8 }
  0x51   :  { %vm115_vm3 = vcmp.eq.s32.totalorder %v105_v3, %v3175_v4  ;;  %235 = vadd.xlane.f32.xlu0 %v3176_v6  ;;  %3573 = vmatpush3.bf16.msra.mxu0 %v3658_v7  ;;  %v295_v19 = vld [vmem:[#allocation7 + $0x40] sm:$0xff]  ;;  %v3189_v21 = vcombine.high %v287_v17, %v291_v18  ;;  %v3188_v22 = vcombine.low %v287_v17, %v291_v18  ;;  %v285_v28 = vld [vmem:[%s4493_s2 + $0x8] sm:$0xff]  ;;  %v297_v39 = vld [vmem:[#allocation7 + $0x50] sm:$0xff]  ;;  %p4174_p4 = scmp.ne.s32.totalorder %s3162_s8, %s4173_s24  ;;  %p4179_p6 = scmp.lt.s32.totalorder %s4173_s24, %s4173_s24 }
  0x52   :  { %v3177_v8 = vsel %vm115_vm3, 1.0, %v4213_v1  ;;  %3574 = vmatprep.subr.bf16.mxu0 %v4213_v1  ;;  %vm4366_vm4 = vmpackc.low %vm115_vm3, %vm114_vm2  ;;  %v299_v23 = vld [vmem:[#allocation7 + $0x60] sm:$0xff]  ;;  %v296_v30 = vld [vmem:[#allocation7 + $0x48] sm:$0xff]  ;;  %v3191_v32 = vcombine.high %v288_v25, %v292_v26  ;;  %v3190_v34 = vcombine.low %v288_v25, %v292_v26  ;;  %v3193_v41 = vcombine.high %v289_v35, %v293_v36 }
  0x53   :  { %v3197_v24 = vcombine.high %v295_v19, %v299_v23  ;;  %386 = vmatprep.subr.bf16.mxu1 %v3189_v21  ;;  %v284_v27 = vld [vmem:[%s4493_s2] sm:$0xff]  ;;  %v3196_v29 = vcombine.low %v295_v19, %v299_v23  ;;  %v300_v31 = vld [vmem:[#allocation7 + $0x68] sm:$0xff]  ;;  %v301_v40 = vld [vmem:[#allocation7 + $0x70] sm:$0xff]  ;;  %v3192_v42 = vcombine.low %v289_v35, %v293_v36  ;;  %p4180_p7 = por %p4179_p6, %p4178_p5 }
  0x54   :  { %387 = vmatpush1.bf16.msra.mxu1 %v3188_v22  ;;  %v286_v33 = vpack.c.bf16 %v285_v28, %v284_v27  ;;  %v3199_v37 = vcombine.high %v296_v30, %v300_v31  ;;  %v3198_v38 = vcombine.low %v296_v30, %v300_v31  ;;  %v3201_v43 = vcombine.high %v297_v39, %v301_v40  ;;  %v233_v45 = vld [vmem:[#allocation3] sm:$0xff]  ;;  %v234_v48 = vld [vmem:[#allocation3 + $0x8] sm:$0xff]  ;;  %v268_v63 = vld [vmem:[#allocation4] sm:$0xff] }
  0x55   :  { %237 = vadd.xlane.f32.xlu0 %v3177_v8  ;;  %3575 = vmatpush3.bf16.msra.mxu0 %v3659_v9  ;;  %v3200_v44 = vcombine.low %v297_v39, %v301_v40  ;;  %v290_v53 = vld [vmem:[#allocation7 + $0x18] sm:$0xff]  ;;  %v272_v0 = vld [vmem:[#allocation4 + $0x20] sm:$0xff]  ;;  %v4396_v8 = vld [vmem:[#allocation4 + $0x8] sm:$0xff]  ;;  %p4181_p8 = pnand %p4180_p7, %p4174_p4 }
  0x56   :  { %3576 = vmatprep.subr.bf16.mxu0 %v4213_v1  ;;  %388 = vmatprep.subr.bf16.mxu1 %v3197_v24  ;;  %v294_v54 = vld [vmem:[#allocation7 + $0x38] sm:$0xff]  ;;  %v3208_v3 = vcombine.low %v268_v63, %v272_v0  ;;  %v276_v4 = vld [vmem:[#allocation4 + $0x40] sm:$0xff]  ;;  %v4398_v9 = vld [vmem:[#allocation4 + $0x28] sm:$0xff] }
  0x57   :  { %v3195_v56 = vcombine.high %v290_v53, %v294_v54  ;;  %v3194_v58 = vcombine.low %v290_v53, %v294_v54  ;;  %v298_v59 = vld [vmem:[#allocation7 + $0x58] sm:$0xff]  ;;  %v280_v5 = vld [vmem:[#allocation4 + $0x60] sm:$0xff]  ;;  %v122_v39 = vld [vmem:[#allocation2 + $0x8] sm:$0xff] }
  0x58   :  { %389 = vmatpush1.bf16.msra.mxu1 %v3196_v29  ;;  %v302_v60 = vld [vmem:[#allocation7 + $0x78] sm:$0xff]  ;;  %v3217_v6 = vcombine.high %v276_v4, %v280_v5  ;;  %v3216_v7 = vcombine.low %v276_v4, %v280_v5  ;;  %v3673_v14 = vld [vmem:[#allocation9 + $0x24] ss:$16 sps:$4 sm:$0xff]   ;;  %v3677_v18 = vld [vmem:[#allocation9 + $0x40] ss:$16 sps:$4 sm:$0xff]  }
  0x59   :  { %3577 = vmatpush3.bf16.msra.mxu0 %v3660_v10  ;;  %429 = vmatprep.subr.bf16.mxu1 %v3191_v32  ;;  %v3203_v61 = vcombine.high %v298_v59, %v302_v60  ;;  %v3202_v62 = vcombine.low %v298_v59, %v302_v60  ;;  %v3211_v10 = vcombine.high %v4396_v8, %v4398_v9  ;;  %v3679_v17 = vld [vmem:[#allocation9 + $0x44] ss:$16 sps:$4 sm:$0xff]   ;;  %v3689_v22 = vld [vmem:[#allocation9 + $0x80] ss:$16 sps:$4 sm:$0xff]  }
  0x5a   :  { %3578 = vmatprep.subr.bf16.mxu0 %v4213_v1  ;;  %v3685_v19 = vld [vmem:[#allocation9 + $0x64] ss:$16 sps:$4 sm:$0xff]   ;;  %v3695_v24 = vld [vmem:[#allocation9 + $0xa0] ss:$16 sps:$4 sm:$0xff]  }
  0x5b   :  { %3204 = vmatmul.mubr.msk.bf16.vlgmr.msra.gmra.mrb[0].mxu1 %vm96_vm5, %v286_v33  ;;  %v3691_v21 = vld [vmem:[#allocation9 + $0x84] ss:$16 sps:$4 sm:$0xff]   ;;  %v3701_v26 = vld [vmem:[#allocation9 + $0xc0] ss:$16 sps:$4 sm:$0xff]  }
  0x5c   :  { %430 = vmatpush1.bf16.msra.mxu1 %v3190_v34  ;;  %461 = vmatprep.mubr.bf16.mxu1 %v4215_v15  ;;  %v3697_v23 = vld [vmem:[#allocation9 + $0xa4] ss:$16 sps:$4 sm:$0xff]   ;;  %v3707_v28 = vld [vmem:[#allocation9 + $0xe0] ss:$16 sps:$4 sm:$0xff]  }
  0x5d   :  { %3579 = vmatpush3.bf16.msra.mxu0 %v3661_v11  ;;  %431 = vmatprep.subr.bf16.mxu1 %v3199_v37  ;;  %v3210_v11 = vcombine.low %v4396_v8, %v4398_v9  ;;  %v3703_v25 = vld [vmem:[#allocation9 + $0xc4] ss:$16 sps:$4 sm:$0xff]   ;;  %v3713_v30 = vld [vmem:[#allocation9 + $0x100] ss:$16 sps:$4 sm:$0xff]   ;;  %v279_v9 = vld [vmem:[#allocation4 + $0x58] sm:$0xff] }
  0x5e   :  { %3580 = vmatprep.subr.bf16.mxu0 %v4213_v1  ;;  %v3709_v27 = vld [vmem:[#allocation9 + $0xe4] ss:$16 sps:$4 sm:$0xff]   ;;  %v3719_v32 = vld [vmem:[#allocation9 + $0x120] ss:$16 sps:$4 sm:$0xff]  }
  0x5f   :  { %v3715_v29 = vld [vmem:[#allocation9 + $0x104] ss:$16 sps:$4 sm:$0xff]   ;;  %v3725_v34 = vld [vmem:[#allocation9 + $0x140] ss:$16 sps:$4 sm:$0xff]  }
  0x60   :  { %432 = vmatpush1.bf16.msra.mxu1 %v3198_v38  ;;  %v3721_v31 = vld [vmem:[#allocation9 + $0x124] ss:$16 sps:$4 sm:$0xff]   ;;  %v3731_v37 = vld [vmem:[#allocation9 + $0x160] ss:$16 sps:$4 sm:$0xff]  }
  0x61   :  { %3581 = vmatpush3.bf16.msra.mxu0 %v3662_v12  ;;  %472 = vmatprep.subr.bf16.mxu1 %v3193_v41  ;;  %v3665_v12 = vld [vmem:[#allocation9] ss:$16 sps:$4 sm:$0xff]   ;;  %v3733_v35 = vld [vmem:[#allocation9 + $0x164] ss:$16 sps:$4 sm:$0xff]  }
  0x62   :  { %3582 = vmatprep.subr.bf16.mxu0 %v4213_v1  ;;  %v121_v36 = vld [vmem:[#allocation2] sm:$0xff] }
  0x63   :  { %3205 = vmatmul.mubr.msk.bf16.vlgmr.msra.gmra.mrb[4].mxu1 %vm96_vm5, %v286_v33  ;;  %v3739_v40 = vld [vmem:[#allocation9 + $0x184] ss:$16 sps:$4 sm:$0xff]  }
  0x64   :  { %473 = vmatpush1.bf16.msra.mxu1 %v3192_v42  ;;  %504 = vmatprep.mubr.bf16.mxu1 %v4215_v15 }
  0x65   :  { %3583 = vmatpush3.bf16.msra.mxu0 %v3663_v13  ;;  %474 = vmatprep.subr.bf16.mxu1 %v3201_v43  ;;  %v3667_v13 = vld [vmem:[#allocation9 + $0x4] ss:$16 sps:$4 sm:$0xff]  }
  0x66   :  { %3584 = vmatprep.subr.bf16.mxu0 %v4213_v1  ;;  %v3209_v1 = vcombine.high %v268_v63, %v272_v0 }
  0x68   :  { %475 = vmatpush1.bf16.msra.mxu1 %v3200_v44  ;;  %v3737_v44 = vld [vmem:[#allocation9 + $0x180] ss:$16 sps:$4 sm:$0xff]  }
  0x69   :  { %3585 = vmatpush3.bf16.msra.mxu0 %v3664_v16  ;;  %515 = vmatprep.subr.bf16.mxu1 %v3195_v56  ;;  %v3671_v16 = vld [vmem:[#allocation9 + $0x20] ss:$16 sps:$4 sm:$0xff]   ;;  %v281_v56 = vld [vmem:[#allocation4 + $0x68] sm:$0xff] }
  0x6a   :  { %2453 = vmatprep.subr.bf16.mxu0 %v3667_v13 }
  0x6b   :  { %3206 = vmatmul.mubr.msk.bf16.vlgmr.msra.gmra.mrb[8].mxu1 %vm96_vm5, %v286_v33 }
  0x6c   :  { %3587 = vmatmul.mubr.msk.bf16.vlgmr.msra.gmra.mrb[0].mxu0 %vm4366_vm4, %v4216_v20  ;;  %547 = vmatprep.mubr.bf16.mxu1 %v4215_v15  ;;  %v3683_v20 = vld [vmem:[#allocation9 + $0x60] ss:$16 sps:$4 sm:$0xff]  }
  0x6d   :  { %516 = vmatpush1.bf16.msra.mxu1 %v3194_v58  ;;  %2454 = vmatpush1.bf16.msra.mxu0 %v3665_v12 }
  0x6e   :  { %517 = vmatprep.subr.bf16.mxu1 %v3203_v61  ;;  %2455 = vmatprep.subr.bf16.mxu0 %v3673_v14  ;;  %v270_v61 = vld [vmem:[#allocation4 + $0x10] sm:$0xff] }
  0x71   :  { %518 = vmatpush1.bf16.msra.mxu1 %v3202_v62  ;;  %2456 = vmatpush1.bf16.msra.mxu0 %v3671_v16  ;;  %v274_v62 = vld [vmem:[#allocation4 + $0x30] sm:$0xff]  ;;  %v3670_v16 = vld [vmem:[#allocation9 + $0xc] ss:$16 sps:$4 sm:$0xff]  }
  0x72   :  { %641 = vmatprep.subr.bf16.mxu1 %v3209_v1  ;;  %2457 = vmatprep.subr.bf16.mxu0 %v3679_v17  ;;  %v3213_v0 = vcombine.high %v270_v61, %v274_v62  ;;  %v278_v1 = vld [vmem:[#allocation4 + $0x50] sm:$0xff]  ;;  %v3212_v4 = vcombine.low %v270_v61, %v274_v62  ;;  %v3668_v17 = vld [vmem:[#allocation9 + $0x8] ss:$16 sps:$4 sm:$0xff]   ;;  %v825_v61 = vsub.s32 2, %v4330_v2 }
  0x74   :  { %3207 = vmatmul.mubr.msk.bf16.vlgmr.msra.gmra.mrb[12].mxu1 %vm96_vm5, %v286_v33  ;;  %v3727_v33 = vld [vmem:[#allocation9 + $0x144] ss:$16 sps:$4 sm:$0xff]  }
  0x75   :  { %642 = vmatpush1.bf16.msra.mxu1 %v3208_v3  ;;  %673 = vmatprep.mubr.bf16.mxu1 %v4215_v15  ;;  %v282_v3 = vld [vmem:[#allocation4 + $0x70] sm:$0xff] }
  0x76   :  { %643 = vmatprep.subr.bf16.mxu1 %v3217_v6  ;;  %2458 = vmatpush1.bf16.msra.mxu0 %v3677_v18  ;;  %v3221_v5 = vcombine.high %v278_v1, %v282_v3  ;;  %v271_v6 = vld [vmem:[#allocation4 + $0x18] sm:$0xff] }
  0x77   :  { %2459 = vmatprep.subr.bf16.mxu0 %v3685_v19  ;;  %v3676_v18 = vld [vmem:[#allocation9 + $0x2c] ss:$16 sps:$4 sm:$0xff]   ;;  %v3674_v19 = vld [vmem:[#allocation9 + $0x28] ss:$16 sps:$4 sm:$0xff]  }
  0x79   :  { %644 = vmatpush1.bf16.msra.mxu1 %v3216_v7  ;;  %v275_v7 = vld [vmem:[#allocation4 + $0x38] sm:$0xff] }
  0x7a   :  { %684 = vmatprep.subr.bf16.mxu1 %v3211_v10  ;;  %2460 = vmatpush1.bf16.msra.mxu0 %v3683_v20  ;;  %v3220_v10 = vcombine.low %v278_v1, %v282_v3  ;;  %v3215_v8 = vcombine.high %v271_v6, %v275_v7  ;;  %v3214_v12 = vcombine.low %v271_v6, %v275_v7  ;;  %v3682_v20 = vld [vmem:[#allocation9 + $0x4c] ss:$16 sps:$4 sm:$0xff]  }
  0x7b   :  { %2461 = vmatprep.subr.bf16.mxu0 %v3691_v21  ;;  %v3680_v21 = vld [vmem:[#allocation9 + $0x48] ss:$16 sps:$4 sm:$0xff]  }
  0x7e   :  { %2462 = vmatpush1.bf16.msra.mxu0 %v3689_v22  ;;  %v3688_v22 = vld [vmem:[#allocation9 + $0x6c] ss:$16 sps:$4 sm:$0xff]  }
  0x7f   :  { %2463 = vmatprep.subr.bf16.mxu0 %v3697_v23  ;;  %v3686_v23 = vld [vmem:[#allocation9 + $0x68] ss:$16 sps:$4 sm:$0xff]  }
  0x82   :  { %2464 = vmatpush1.bf16.msra.mxu0 %v3695_v24  ;;  %v3692_v24 = vld [vmem:[#allocation9 + $0x88] ss:$16 sps:$4 sm:$0xff]  }
  0x83   :  { %2465 = vmatprep.subr.bf16.mxu0 %v3703_v25  ;;  %v3700_v25 = vld [vmem:[#allocation9 + $0xac] ss:$16 sps:$4 sm:$0xff]  }
  0x86   :  { %2466 = vmatpush1.bf16.msra.mxu0 %v3701_v26  ;;  %v3698_v26 = vld [vmem:[#allocation9 + $0xa8] ss:$16 sps:$4 sm:$0xff]  }
  0x87   :  { %2467 = vmatprep.subr.bf16.mxu0 %v3709_v27  ;;  %v3706_v27 = vld [vmem:[#allocation9 + $0xcc] ss:$16 sps:$4 sm:$0xff]  }
  0x8a   :  { %2468 = vmatpush1.bf16.msra.mxu0 %v3707_v28  ;;  %v3704_v28 = vld [vmem:[#allocation9 + $0xc8] ss:$16 sps:$4 sm:$0xff]  }
  0x8b   :  { %2469 = vmatprep.subr.bf16.mxu0 %v3715_v29  ;;  %v3712_v29 = vld [vmem:[#allocation9 + $0xec] ss:$16 sps:$4 sm:$0xff]  }
  0x8e   :  { %2470 = vmatpush1.bf16.msra.mxu0 %v3713_v30  ;;  %v3710_v30 = vld [vmem:[#allocation9 + $0xe8] ss:$16 sps:$4 sm:$0xff]  }
  0x8f   :  { %2471 = vmatprep.subr.bf16.mxu0 %v3721_v31  ;;  %v3718_v31 = vld [vmem:[#allocation9 + $0x10c] ss:$16 sps:$4 sm:$0xff]  }
  0x92   :  { %2472 = vmatpush1.bf16.msra.mxu0 %v3719_v32  ;;  %v3716_v32 = vld [vmem:[#allocation9 + $0x108] ss:$16 sps:$4 sm:$0xff]  }
  0x93   :  { %2473 = vmatprep.subr.bf16.mxu0 %v3727_v33  ;;  %v3724_v33 = vld [vmem:[#allocation9 + $0x12c] ss:$16 sps:$4 sm:$0xff]  }
  0x96   :  { %2474 = vmatpush1.bf16.msra.mxu0 %v3725_v34  ;;  %v3722_v34 = vld [vmem:[#allocation9 + $0x128] ss:$16 sps:$4 sm:$0xff]  }
  0x97   :  { %2475 = vmatprep.subr.bf16.mxu0 %v3733_v35  ;;  %v3730_v35 = vld [vmem:[#allocation9 + $0x14c] ss:$16 sps:$4 sm:$0xff]  }
  0x9a   :  { %2476 = vmatpush1.bf16.msra.mxu0 %v3731_v37  ;;  %v3736_v37 = vld [vmem:[#allocation9 + $0x16c] ss:$16 sps:$4 sm:$0xff]  }
  0x9b   :  { %2477 = vmatprep.subr.bf16.mxu0 %v3739_v40  ;;  %v3740_v40 = vld [vmem:[#allocation9 + $0x188] ss:$16 sps:$4 sm:$0xff]  }
  0x9e   :  { %2478 = vmatpush1.bf16.msra.mxu0 %v3737_v44  ;;  %v3754_v44 = vld [vmem:[#allocation9 + $0x1cc] ss:$16 sps:$4 sm:$0xff]  }
  0xde   :  { %v236_v46 = vpop.xlane.xlu0 %235 }
  0xdf   :  { %v239_v47 = vadd.f32 %v236_v46, %v233_v45 }
  0xe1   :  { %242 = vst.msk [vmem:[#allocation3] sm:$0xff] %vm99_vm1, %v239_v47  ;;  %v3745_v47 = vld [vmem:[#allocation9 + $0x1a4] ss:$16 sps:$4 sm:$0xff]  }
  0xe2   :  { %v238_v49 = vpop.xlane.xlu0 %237  ;;  %2479 = vmatprep.subr.bf16.mxu0 %v3745_v47  ;;  %v3757_v47 = vld [vmem:[#allocation9 + $0x1e4] ss:$16 sps:$4 sm:$0xff]  }
  0xe3   :  { %v240_v50 = vadd.f32 %v238_v49, %v234_v48  ;;  %v3743_v48 = vld [vmem:[#allocation9 + $0x1a0] ss:$16 sps:$4 sm:$0xff]  }
  0xe4   :  { %2480 = vmatpush1.bf16.msra.mxu0 %v3743_v48  ;;  %v3760_v48 = vld [vmem:[#allocation9 + $0x1ec] ss:$16 sps:$4 sm:$0xff]  }
  0xe5   :  { %243 = vst.msk [vmem:[#allocation3 + $0x8] sm:$0xff] %vm99_vm1, %v240_v50 }
  0xe8   :  { %v247_v51 = vld [vmem:[#allocation3] sm:$0xff] }
  0xe9   :  { %v249_v52 = vmax.f32 %v247_v51, 1.0 }
  0xeb   :  { %255 = vperm.xlu1 %3655, %v249_v52  }
  0xec   :  { %v248_v55 = vld [vmem:[#allocation3 + $0x8] sm:$0xff] }
  0xed   :  { %v250_v57 = vmax.f32 %v248_v55, 1.0  ;;  %v277_v55 = vld [vmem:[#allocation4 + $0x48] sm:$0xff] }
  0xee   :  { %v3219_v60 = vcombine.high %v277_v55, %v281_v56  ;;  %v3218_v63 = vcombine.low %v277_v55, %v281_v56  ;;  %v821_v55 = vsub.s32 1, %v4330_v2 }
  0xef   :  { %260 = vperm.xlu1 %3655, %v250_v57  }
 0x13f   :  { %v221_v38 = vpop.f32.mrb[0].mxu0 }
 0x140   :  { %v228_v41 = vadd.f32 %v221_v38, %v121_v36  ;;  %v3588_v42 = vpop.f32.mrb[1].mxu0  ;;  %v3728_v36 = vld [vmem:[#allocation9 + $0x148] ss:$16 sps:$4 sm:$0xff]  }
 0x141   :  { %v224_v43 = vpop.f32.mrb[2].mxu0  ;;  %v3734_v38 = vld [vmem:[#allocation9 + $0x168] ss:$16 sps:$4 sm:$0xff]  }
 0x142   :  { %231 = vst.msk [vmem:[#allocation2] sm:$0xff] %vm96_vm5, %v228_v41  ;;  %v229_v45 = vadd.f32 %v224_v43, %v122_v39  ;;  %v3589_v46 = vpop.f32.mrb[3].mxu0  ;;  %v3742_v39 = vld [vmem:[#allocation9 + $0x18c] ss:$16 sps:$4 sm:$0xff]   ;;  %v3746_v42 = vld [vmem:[#allocation9 + $0x1a8] ss:$16 sps:$4 sm:$0xff]  }
 0x143   :  { %v3748_v41 = vld [vmem:[#allocation9 + $0x1ac] ss:$16 sps:$4 sm:$0xff]   ;;  %v3751_v43 = vld [vmem:[#allocation9 + $0x1c4] ss:$16 sps:$4 sm:$0xff]   ;;  %v3752_v46 = vld [vmem:[#allocation9 + $0x1c8] ss:$16 sps:$4 sm:$0xff]  }
 0x144   :  { %232 = vst.msk [vmem:[#allocation2 + $0x8] sm:$0xff] %vm96_vm5, %v229_v45  ;;  %v3749_v45 = vld [vmem:[#allocation9 + $0x1c0] ss:$16 sps:$4 sm:$0xff]   ;;  %2481 = vmatprep.subr.bf16.mxu0 %v3751_v43 }
 0x145   :  { %2482 = vmatpush1.bf16.msra.mxu0 %v3749_v45  ;;  %v3784_v45 = vld [vmem:[#allocation9 + $0x26c] ss:$16 sps:$4 sm:$0xff]  }
 0x146   :  { %2483 = vmatprep.subr.bf16.mxu0 %v3757_v47 }
 0x149   :  { %v251_v52 = vld [vmem:[#allocation2] sm:$0xff] }
 0x14b   :  { %v252_v54 = vld [vmem:[#allocation2 + $0x8] sm:$0xff] }
 0x16a   :  { %v256_v49 = vpop.permute.xlu1 %255 }
 0x16b   :  { %4081 = vrcp.f32 %v256_v49  ;;  %v3755_v49 = vld [vmem:[#allocation9 + $0x1e0] ss:$16 sps:$4 sm:$0xff]  }
 0x16c   :  { %2484 = vmatpush1.bf16.msra.mxu0 %v3755_v49  ;;  %v845_v49 = vsub.s32 7, %v4330_v2 }
 0x16e   :  { %v261_v50 = vpop.permute.xlu1 %260 }
 0x16f   :  { %4083 = vrcp.f32 %v261_v50  ;;  %v3758_v50 = vld [vmem:[#allocation9 + $0x1e8] ss:$16 sps:$4 sm:$0xff]  }
 0x175   :  { %v4082_v51 = vpop.eup %4081 }
 0x176   :  { %v264_v57 = vmul.f32 %v4082_v51, %v251_v52  ;;  %v3763_v51 = vld [vmem:[#allocation9 + $0x204] ss:$16 sps:$4 sm:$0xff]   ;;  %v3766_v52 = vld [vmem:[#allocation9 + $0x20c] ss:$16 sps:$4 sm:$0xff]  }
 0x177   :  { %2496 = vmatprep.subr.bf16.mxu0 %v3763_v51 }
 0x179   :  { %v4084_v53 = vpop.eup %4083 }
 0x17a   :  { %v266_v58 = vmul.f32 %v4084_v53, %v252_v54  ;;  %v817_v53 = vsub.s32 0, %v4330_v2  ;;  %v4420_v54 = vld [vmem:[%s4496_s5] sm:$0xff] }
 0x17b   :  { %v826_v7 = vrot.slane %v4420_v54, %v825_v61 }
 0x17c   :  { %v267_v59 = vpack.c.bf16 %v266_v58, %v264_v57  ;;  %v818_v56 = vrot.slane %v4420_v54, %v817_v53  ;;  %v822_v57 = vrot.slane %v4420_v54, %v821_v55 }
 0x17e   :  { %3224 = vmatmul.mubr.msk.bf16.vlgmr.msra.gmra.mrb[0].mxu1 %vm96_vm5, %v267_v59 }
 0x17f   :  { %685 = vmatpush1.bf16.msra.mxu1 %v3210_v11  ;;  %716 = vmatprep.mubr.bf16.mxu1 %v4215_v15  ;;  %v283_v11 = vld [vmem:[#allocation4 + $0x78] sm:$0xff] }
 0x180   :  { %686 = vmatprep.subr.bf16.mxu1 %v3219_v60  ;;  %v3223_v13 = vcombine.high %v279_v9, %v283_v11  ;;  %v3222_v14 = vcombine.low %v279_v9, %v283_v11 }
 0x183   :  { %687 = vmatpush1.bf16.msra.mxu1 %v3218_v63 }
 0x184   :  { %727 = vmatprep.subr.bf16.mxu1 %v3213_v0  ;;  %v829_v0 = vsub.s32 3, %v4330_v2 }
 0x186   :  { %3225 = vmatmul.mubr.msk.bf16.vlgmr.msra.gmra.mrb[4].mxu1 %vm96_vm5, %v267_v59  ;;  %v830_v9 = vrot.slane %v4420_v54, %v829_v0 }
 0x187   :  { %728 = vmatpush1.bf16.msra.mxu1 %v3212_v4  ;;  %759 = vmatprep.mubr.bf16.mxu1 %v4215_v15 }
 0x188   :  { %729 = vmatprep.subr.bf16.mxu1 %v3221_v5 }
 0x18b   :  { %730 = vmatpush1.bf16.msra.mxu1 %v3220_v10 }
 0x18c   :  { %770 = vmatprep.subr.bf16.mxu1 %v3215_v8 }
 0x18e   :  { %3226 = vmatmul.mubr.msk.bf16.vlgmr.msra.gmra.mrb[8].mxu1 %vm96_vm5, %v267_v59 }
 0x18f   :  { %771 = vmatpush1.bf16.msra.mxu1 %v3214_v12  ;;  %802 = vmatprep.mubr.bf16.mxu1 %v4215_v15  ;;  %v3694_v15 = vld [vmem:[#allocation9 + $0x8c] ss:$16 sps:$4 sm:$0xff]  }
 0x190   :  { %772 = vmatprep.subr.bf16.mxu1 %v3223_v13 }
 0x193   :  { %773 = vmatpush1.bf16.msra.mxu1 %v3222_v14  ;;  %v3761_v14 = vld [vmem:[#allocation9 + $0x200] ss:$16 sps:$4 sm:$0xff]  }
 0x194   :  { %2625 = vmatprep.subr.bf16.mxu1 %v3670_v16  ;;  %v3764_v16 = vld [vmem:[#allocation9 + $0x208] ss:$16 sps:$4 sm:$0xff]  }
 0x196   :  { %3227 = vmatmul.mubr.msk.bf16.vlgmr.msra.gmra.mrb[12].mxu1 %vm96_vm5, %v267_v59 }
 0x197   :  { %2626 = vmatpush1.bf16.msra.mxu1 %v3668_v17 }
 0x198   :  { %2627 = vmatprep.subr.bf16.mxu1 %v3676_v18 }
 0x19b   :  { %2628 = vmatpush1.bf16.msra.mxu1 %v3674_v19  ;;  %v3769_v19 = vld [vmem:[#allocation9 + $0x224] ss:$16 sps:$4 sm:$0xff]  }
 0x19c   :  { %2629 = vmatprep.subr.bf16.mxu1 %v3682_v20  ;;  %v3772_v20 = vld [vmem:[#allocation9 + $0x22c] ss:$16 sps:$4 sm:$0xff]  }
 0x19f   :  { %2630 = vmatpush1.bf16.msra.mxu1 %v3680_v21  ;;  %v833_v21 = vsub.s32 4, %v4330_v2 }
 0x1a0   :  { %2631 = vmatprep.subr.bf16.mxu1 %v3688_v22 }
 0x1a3   :  { %2632 = vmatpush1.bf16.msra.mxu1 %v3686_v23 }
 0x1a4   :  { %2633 = vmatprep.subr.bf16.mxu1 %v3694_v15  ;;  %v837_v15 = vsub.s32 5, %v4330_v2 }
 0x1a7   :  { %2634 = vmatpush1.bf16.msra.mxu1 %v3692_v24 }
 0x1a8   :  { %2635 = vmatprep.subr.bf16.mxu1 %v3700_v25 }
 0x1ab   :  { %2636 = vmatpush1.bf16.msra.mxu1 %v3698_v26 }
 0x1ac   :  { %2637 = vmatprep.subr.bf16.mxu1 %v3706_v27  ;;  %v3767_v27 = vld [vmem:[#allocation9 + $0x220] ss:$16 sps:$4 sm:$0xff]  }
 0x1af   :  { %2638 = vmatpush1.bf16.msra.mxu1 %v3704_v28  ;;  %v3770_v28 = vld [vmem:[#allocation9 + $0x228] ss:$16 sps:$4 sm:$0xff]  }
 0x1b0   :  { %2639 = vmatprep.subr.bf16.mxu1 %v3712_v29 }
 0x1b3   :  { %2640 = vmatpush1.bf16.msra.mxu1 %v3710_v30 }
 0x1b4   :  { %2641 = vmatprep.subr.bf16.mxu1 %v3718_v31  ;;  %v834_v31 = vrot.slane %v4420_v54, %v833_v21 }
 0x1b7   :  { %2642 = vmatpush1.bf16.msra.mxu1 %v3716_v32  ;;  %v3775_v32 = vld [vmem:[#allocation9 + $0x244] ss:$16 sps:$4 sm:$0xff]  }
 0x1b8   :  { %2643 = vmatprep.subr.bf16.mxu1 %v3724_v33  ;;  %v3778_v33 = vld [vmem:[#allocation9 + $0x24c] ss:$16 sps:$4 sm:$0xff]  }
 0x1bb   :  { %2644 = vmatpush1.bf16.msra.mxu1 %v3722_v34 }
 0x1bc   :  { %2645 = vmatprep.subr.bf16.mxu1 %v3730_v35 }
 0x1bf   :  { %2646 = vmatpush1.bf16.msra.mxu1 %v3728_v36  ;;  %v838_v36 = vrot.slane %v4420_v54, %v837_v15  ;;  %v3802_v15 = vld [vmem:[#allocation9 + $0x2cc] ss:$16 sps:$4 sm:$0xff]  }
 0x1c0   :  { %2647 = vmatprep.subr.bf16.mxu1 %v3736_v37 }
 0x1c3   :  { %2648 = vmatpush1.bf16.msra.mxu1 %v3734_v38 }
 0x1c4   :  { %2649 = vmatprep.subr.bf16.mxu1 %v3742_v39 }
 0x1c7   :  { %2650 = vmatpush1.bf16.msra.mxu1 %v3740_v40  ;;  %v3773_v40 = vld [vmem:[#allocation9 + $0x240] ss:$16 sps:$4 sm:$0xff]  }
 0x1c8   :  { %2651 = vmatprep.subr.bf16.mxu1 %v3748_v41  ;;  %v3776_v41 = vld [vmem:[#allocation9 + $0x248] ss:$16 sps:$4 sm:$0xff]  }
 0x1cb   :  { %2652 = vmatpush1.bf16.msra.mxu1 %v3746_v42 }
 0x1cc   :  { %2653 = vmatprep.subr.bf16.mxu1 %v3754_v44  ;;  %v3781_v44 = vld [vmem:[#allocation9 + $0x264] ss:$16 sps:$4 sm:$0xff]  }
 0x1cf   :  { %2654 = vmatpush1.bf16.msra.mxu1 %v3752_v46  ;;  %v841_v46 = vsub.s32 6, %v4330_v2 }
 0x1d0   :  { %2655 = vmatprep.subr.bf16.mxu1 %v3760_v48 }
 0x1d3   :  { %2656 = vmatpush1.bf16.msra.mxu1 %v3758_v50 }
 0x1d4   :  { %2668 = vmatprep.subr.bf16.mxu1 %v3766_v52 }
 0x251   :  { %v675_v58 = vpop.f32.mrb[0].mxu1 }
 0x252   :  { %v855_v59 = vadd.f32 %v818_v56, %v675_v58  ;;  %v677_v60 = vpop.f32.mrb[1].mxu1 }
 0x253   :  { %v856_v62 = vadd.f32 %v822_v57, %v677_v60  ;;  %v679_v63 = vpop.f32.mrb[2].mxu1  ;;  %v842_v60 = vrot.slane %v4420_v54, %v841_v46  ;;  %v3824_v46 = vld [vmem:[#allocation9 + $0x348] ss:$16 sps:$4 sm:$0xff]  }
 0x254   :  { %v863_v1 = vadd.f32 %v818_v56, %v679_v63  ;;  %v681_v3 = vpop.f32.mrb[3].mxu1  ;;  %v871_v5 = vmax.f32 %v855_v59, 0.0  ;;  %v3779_v56 = vld [vmem:[#allocation9 + $0x260] ss:$16 sps:$4 sm:$0xff]   ;;  %v3790_v63 = vld [vmem:[#allocation9 + $0x28c] ss:$16 sps:$4 sm:$0xff]  }
 0x255   :  { %v864_v4 = vadd.f32 %v822_v57, %v681_v3  ;;  %v872_v10 = vmax.f32 %v856_v62, 0.0  ;;  %v3782_v57 = vld [vmem:[#allocation9 + $0x268] ss:$16 sps:$4 sm:$0xff]   ;;  %v3787_v62 = vld [vmem:[#allocation9 + $0x284] ss:$16 sps:$4 sm:$0xff]  }
 0x256   :  { %v879_v6 = vmax.f32 %v863_v1, 0.0 }
 0x257   :  { %v880_v8 = vmax.f32 %v864_v4, 0.0  ;;  %v846_v4 = vrot.slane %v4420_v54, %v845_v49  ;;  %v3827_v49 = vld [vmem:[#allocation9 + $0x360] ss:$16 sps:$4 sm:$0xff]  }
 0x258   :  { %v887_v11 = vpack.c.bf16 %v879_v6, %v871_v5 }
 0x259   :  { %v888_v12 = vpack.c.bf16 %v880_v8, %v872_v10  ;;  %v718_v13 = vpop.f32.mrb[4].mxu1  ;;  %v3785_v10 = vld [vmem:[#allocation9 + $0x280] ss:$16 sps:$4 sm:$0xff]   ;;  %v3788_v8 = vld [vmem:[#allocation9 + $0x288] ss:$16 sps:$4 sm:$0xff]  }
 0x25a   :  { %v857_v17 = vadd.f32 %v826_v7, %v718_v13  ;;  %v720_v18 = vpop.f32.mrb[5].mxu1  ;;  %v3796_v13 = vld [vmem:[#allocation9 + $0x2ac] ss:$16 sps:$4 sm:$0xff]  }
 0x25b   :  { %v858_v22 = vadd.f32 %v830_v9, %v720_v18  ;;  %v722_v23 = vpop.f32.mrb[6].mxu1  ;;  %2485 = vmatprep.mubr.bf16.mxu0 %v888_v12  ;;  %2657 = vmatprep.mubr.bf16.mxu1 %v888_v12  ;;  %v3793_v12 = vld [vmem:[#allocation9 + $0x2a4] ss:$16 sps:$4 sm:$0xff]  }
 0x25c   :  { %v865_v24 = vadd.f32 %v826_v7, %v722_v23  ;;  %v724_v25 = vpop.f32.mrb[7].mxu1  ;;  %2486 = vmatmul.mubr.bf16.vlgmr.msra.gmra.mrb[4].mxu0 %v887_v11  ;;  %2658 = vmatmul.mubr.bf16.vlgmr.msra.gmra.mrb[16].mxu1 %v887_v11  ;;  %v873_v29 = vmax.f32 %v857_v17, 0.0  ;;  %v3799_v23 = vld [vmem:[#allocation9 + $0x2c4] ss:$16 sps:$4 sm:$0xff]  }
 0x25d   :  { %v866_v26 = vadd.f32 %v830_v9, %v724_v25  ;;  %2497 = vmatpush1.bf16.msra.mxu0 %v3761_v14  ;;  %2669 = vmatpush1.bf16.msra.mxu1 %v3764_v16  ;;  %v874_v34 = vmax.f32 %v858_v22, 0.0 }
 0x25e   :  { %v881_v30 = vmax.f32 %v865_v24, 0.0  ;;  %2498 = vmatprep.subr.bf16.mxu0 %v3769_v19  ;;  %2670 = vmatprep.subr.bf16.mxu1 %v3772_v20  ;;  %v3791_v19 = vld [vmem:[#allocation9 + $0x2a0] ss:$16 sps:$4 sm:$0xff]   ;;  %v3794_v20 = vld [vmem:[#allocation9 + $0x2a8] ss:$16 sps:$4 sm:$0xff]  }
 0x25f   :  { %v882_v35 = vmax.f32 %v866_v26, 0.0 }
 0x260   :  { %v4441_v37 = vpack.c.bf16 %v881_v30, %v873_v29  ;;  %v3800_v29 = vld [vmem:[#allocation9 + $0x2c8] ss:$16 sps:$4 sm:$0xff]   ;;  %v3805_v30 = vld [vmem:[#allocation9 + $0x2e4] ss:$16 sps:$4 sm:$0xff]  }
 0x261   :  { %v890_v38 = vpack.c.bf16 %v882_v35, %v874_v34  ;;  %2499 = vmatpush1.bf16.msra.mxu0 %v3767_v27  ;;  %2671 = vmatpush1.bf16.msra.mxu1 %v3770_v28  ;;  %v761_v39 = vpop.f32.mrb[8].mxu1  ;;  %v3797_v28 = vld [vmem:[#allocation9 + $0x2c0] ss:$16 sps:$4 sm:$0xff]   ;;  %v3811_v34 = vld [vmem:[#allocation9 + $0x304] ss:$16 sps:$4 sm:$0xff]  }
 0x262   :  { %v859_v42 = vadd.f32 %v834_v31, %v761_v39  ;;  %v763_v43 = vpop.f32.mrb[9].mxu1  ;;  %2500 = vmatprep.subr.bf16.mxu0 %v3775_v32  ;;  %2672 = vmatprep.subr.bf16.mxu1 %v3778_v33  ;;  %v3803_v32 = vld [vmem:[#allocation9 + $0x2e0] ss:$16 sps:$4 sm:$0xff]   ;;  %v3806_v33 = vld [vmem:[#allocation9 + $0x2e8] ss:$16 sps:$4 sm:$0xff]  }
 0x263   :  { %v860_v47 = vadd.f32 %v838_v36, %v763_v43  ;;  %v765_v48 = vpop.f32.mrb[10].mxu1  ;;  %2528 = vmatprep.mubr.bf16.mxu0 %v890_v38  ;;  %2700 = vmatprep.mubr.bf16.mxu1 %v890_v38  ;;  %v3814_v35 = vld [vmem:[#allocation9 + $0x30c] ss:$16 sps:$4 sm:$0xff]   ;;  %v3812_v38 = vld [vmem:[#allocation9 + $0x308] ss:$16 sps:$4 sm:$0xff]  }
 0x264   :  { %v867_v50 = vadd.f32 %v834_v31, %v765_v48  ;;  %v767_v51 = vpop.f32.mrb[11].mxu1  ;;  %v875_v58 = vmax.f32 %v859_v42, 0.0  ;;  %v3808_v31 = vld [vmem:[#allocation9 + $0x2ec] ss:$16 sps:$4 sm:$0xff]   ;;  %v3817_v39 = vld [vmem:[#allocation9 + $0x324] ss:$16 sps:$4 sm:$0xff]  }
 0x265   :  { %v868_v52 = vadd.f32 %v838_v36, %v767_v51  ;;  %2501 = vmatpush1.bf16.msra.mxu0 %v3773_v40  ;;  %2673 = vmatpush1.bf16.msra.mxu1 %v3776_v41  ;;  %v876_v1 = vmax.f32 %v860_v47, 0.0  ;;  %v3809_v36 = vld [vmem:[#allocation9 + $0x300] ss:$16 sps:$4 sm:$0xff]   ;;  %v3820_v40 = vld [vmem:[#allocation9 + $0x32c] ss:$16 sps:$4 sm:$0xff]  }
 0x266   :  { %v883_v59 = vmax.f32 %v867_v50, 0.0  ;;  %2502 = vmatprep.subr.bf16.mxu0 %v3781_v44  ;;  %2674 = vmatprep.subr.bf16.mxu1 %v3784_v45  ;;  %v3815_v41 = vld [vmem:[#allocation9 + $0x320] ss:$16 sps:$4 sm:$0xff]   ;;  %v3818_v42 = vld [vmem:[#allocation9 + $0x328] ss:$16 sps:$4 sm:$0xff]  }
 0x267   :  { %v884_v3 = vmax.f32 %v868_v52, 0.0  ;;  %v3823_v43 = vld [vmem:[#allocation9 + $0x344] ss:$16 sps:$4 sm:$0xff]   ;;  %v3826_v44 = vld [vmem:[#allocation9 + $0x34c] ss:$16 sps:$4 sm:$0xff]  }
 0x268   :  { %v4447_v5 = vpack.c.bf16 %v883_v59, %v875_v58  ;;  %v3821_v45 = vld [vmem:[#allocation9 + $0x340] ss:$16 sps:$4 sm:$0xff]   ;;  %v3829_v47 = vld [vmem:[#allocation9 + $0x364] ss:$16 sps:$4 sm:$0xff]   ;;  %v3832_v48 = vld [vmem:[#allocation9 + $0x36c] ss:$16 sps:$4 sm:$0xff]  }
 0x269   :  { %v4449_v6 = vpack.c.bf16 %v884_v3, %v876_v1  ;;  %2503 = vmatpush1.bf16.msra.mxu0 %v3779_v56  ;;  %2675 = vmatpush1.bf16.msra.mxu1 %v3782_v57  ;;  %v804_v7 = vpop.f32.mrb[12].mxu1  ;;  %v3830_v50 = vld [vmem:[#allocation9 + $0x368] ss:$16 sps:$4 sm:$0xff]   ;;  %v3835_v51 = vld [vmem:[#allocation9 + $0x384] ss:$16 sps:$4 sm:$0xff]  }
 0x26a   :  { %v861_v9 = vadd.f32 %v842_v60, %v804_v7  ;;  %v806_v11 = vpop.f32.mrb[13].mxu1  ;;  %2504 = vmatprep.subr.bf16.mxu0 %v3787_v62  ;;  %2676 = vmatprep.subr.bf16.mxu1 %v3790_v63  ;;  %v3838_v52 = vld [vmem:[#allocation9 + $0x38c] ss:$16 sps:$4 sm:$0xff]   ;;  %v3833_v56 = vld [vmem:[#allocation9 + $0x380] ss:$16 sps:$4 sm:$0xff]  }
 0x26b   :  { %v862_v14 = vadd.f32 %v846_v4, %v806_v11  ;;  %v808_v16 = vpop.f32.mrb[14].mxu1  ;;  %v3836_v57 = vld [vmem:[#allocation9 + $0x388] ss:$16 sps:$4 sm:$0xff]   ;;  %v3841_v58 = vld [vmem:[#allocation9 + $0x3a4] ss:$16 sps:$4 sm:$0xff]  }
 0x26c   :  { %v869_v17 = vadd.f32 %v842_v60, %v808_v16  ;;  %v810_v18 = vpop.f32.mrb[15].mxu1  ;;  %v877_v21 = vmax.f32 %v861_v9, 0.0  ;;  %v3844_v59 = vld [vmem:[#allocation9 + $0x3ac] ss:$16 sps:$4 sm:$0xff]   ;;  %v3839_v60 = vld [vmem:[#allocation9 + $0x3a0] ss:$16 sps:$4 sm:$0xff]  }
 0x26d   :  { %v870_v54 = vadd.f32 %v846_v4, %v810_v18  ;;  %2505 = vmatpush1.bf16.msra.mxu0 %v3785_v10  ;;  %2677 = vmatpush1.bf16.msra.mxu1 %v3788_v8  ;;  %v878_v24 = vmax.f32 %v862_v14, 0.0  ;;  %v3842_v62 = vld [vmem:[#allocation9 + $0x3a8] ss:$16 sps:$4 sm:$0xff]   ;;  %v3847_v63 = vld [vmem:[#allocation9 + $0x3c4] ss:$16 sps:$4 sm:$0xff]  }
 0x26e   :  { %v885_v22 = vmax.f32 %v869_v17, 0.0  ;;  %2506 = vmatprep.subr.bf16.mxu0 %v3793_v12  ;;  %2678 = vmatprep.subr.bf16.mxu1 %v3796_v13  ;;  %v3850_v1 = vld [vmem:[#allocation9 + $0x3cc] ss:$16 sps:$4 sm:$0xff]   ;;  %v3845_v3 = vld [vmem:[#allocation9 + $0x3c0] ss:$16 sps:$4 sm:$0xff]  }
 0x26f   :  { %v886_v25 = vmax.f32 %v870_v54, 0.0  ;;  %v3848_v4 = vld [vmem:[#allocation9 + $0x3c8] ss:$16 sps:$4 sm:$0xff]   ;;  %v3853_v7 = vld [vmem:[#allocation9 + $0x3e4] ss:$16 sps:$4 sm:$0xff]  }
 0x270   :  { %v4451_v26 = vpack.c.bf16 %v885_v22, %v877_v21  ;;  %v3856_v10 = vld [vmem:[#allocation9 + $0x3ec] ss:$16 sps:$4 sm:$0xff]   ;;  %v3851_v8 = vld [vmem:[#allocation9 + $0x3e0] ss:$16 sps:$4 sm:$0xff]   ;;  %v3854_v9 = vld [vmem:[#allocation9 + $0x3e8] ss:$16 sps:$4 sm:$0xff]  }
 0x271   :  { %v4453_v27 = vpack.c.bf16 %v886_v25, %v878_v24  ;;  %2507 = vmatpush1.bf16.msra.mxu0 %v3791_v19  ;;  %2679 = vmatpush1.bf16.msra.mxu1 %v3794_v20  ;;  %v3859_v11 = vld [vmem:[#allocation9 + $0x404] ss:$16 sps:$4 sm:$0xff]   ;;  %v3862_v12 = vld [vmem:[#allocation9 + $0x40c] ss:$16 sps:$4 sm:$0xff]   ;;  %v3857_v13 = vld [vmem:[#allocation9 + $0x400] ss:$16 sps:$4 sm:$0xff]  }
 0x272   :  { %2508 = vmatprep.subr.bf16.mxu0 %v3799_v23  ;;  %2680 = vmatprep.subr.bf16.mxu1 %v3802_v15  ;;  %v3860_v14 = vld [vmem:[#allocation9 + $0x408] ss:$16 sps:$4 sm:$0xff]   ;;  %v3865_v16 = vld [vmem:[#allocation9 + $0x424] ss:$16 sps:$4 sm:$0xff]   ;;  %v3868_v17 = vld [vmem:[#allocation9 + $0x42c] ss:$16 sps:$4 sm:$0xff]  }
 0x273   :  { %v3863_v18 = vld [vmem:[#allocation9 + $0x420] ss:$16 sps:$4 sm:$0xff]   ;;  %v3866_v54 = vld [vmem:[#allocation9 + $0x428] ss:$16 sps:$4 sm:$0xff]   ;;  %v3871_v19 = vld [vmem:[#allocation9 + $0x444] ss:$16 sps:$4 sm:$0xff]  }
 0x274   :  { %v3874_v20 = vld [vmem:[#allocation9 + $0x44c] ss:$16 sps:$4 sm:$0xff]   ;;  %v3869_v21 = vld [vmem:[#allocation9 + $0x440] ss:$16 sps:$4 sm:$0xff]   ;;  %v3872_v22 = vld [vmem:[#allocation9 + $0x448] ss:$16 sps:$4 sm:$0xff]  }
 0x275   :  { %2509 = vmatpush1.bf16.msra.mxu0 %v3797_v28  ;;  %2681 = vmatpush1.bf16.msra.mxu1 %v3800_v29  ;;  %v3877_v23 = vld [vmem:[#allocation9 + $0x464] ss:$16 sps:$4 sm:$0xff]   ;;  %v3875_v15 = vld [vmem:[#allocation9 + $0x460] ss:$16 sps:$4 sm:$0xff]   ;;  %v3878_v24 = vld [vmem:[#allocation9 + $0x468] ss:$16 sps:$4 sm:$0xff]  }
 0x276   :  { %2510 = vmatprep.subr.bf16.mxu0 %v3805_v30  ;;  %2682 = vmatprep.subr.bf16.mxu1 %v3808_v31  ;;  %v3883_v25 = vld [vmem:[#allocation9 + $0x484] ss:$16 sps:$4 sm:$0xff]   ;;  %v3881_v28 = vld [vmem:[#allocation9 + $0x480] ss:$16 sps:$4 sm:$0xff]   ;;  %v3884_v29 = vld [vmem:[#allocation9 + $0x488] ss:$16 sps:$4 sm:$0xff]  }
 0x277   :  { %v3889_v30 = vld [vmem:[#allocation9 + $0x4a4] ss:$16 sps:$4 sm:$0xff]   ;;  %v3892_v31 = vld [vmem:[#allocation9 + $0x4ac] ss:$16 sps:$4 sm:$0xff]  }
 0x279   :  { %2511 = vmatpush1.bf16.msra.mxu0 %v3803_v32  ;;  %2683 = vmatpush1.bf16.msra.mxu1 %v3806_v33  ;;  %v3887_v32 = vld [vmem:[#allocation9 + $0x4a0] ss:$16 sps:$4 sm:$0xff]   ;;  %v3890_v33 = vld [vmem:[#allocation9 + $0x4a8] ss:$16 sps:$4 sm:$0xff]  }
 0x27a   :  { %2512 = vmatprep.subr.bf16.mxu0 %v3811_v34  ;;  %2684 = vmatprep.subr.bf16.mxu1 %v3814_v35  ;;  %v3895_v34 = vld [vmem:[#allocation9 + $0x4c4] ss:$16 sps:$4 sm:$0xff]   ;;  %v3898_v35 = vld [vmem:[#allocation9 + $0x4cc] ss:$16 sps:$4 sm:$0xff]  }
 0x27d   :  { %2513 = vmatpush1.bf16.msra.mxu0 %v3809_v36  ;;  %2685 = vmatpush1.bf16.msra.mxu1 %v3812_v38  ;;  %v3893_v36 = vld [vmem:[#allocation9 + $0x4c0] ss:$16 sps:$4 sm:$0xff]   ;;  %v3896_v38 = vld [vmem:[#allocation9 + $0x4c8] ss:$16 sps:$4 sm:$0xff]  }
 0x27e   :  { %2514 = vmatprep.subr.bf16.mxu0 %v3817_v39  ;;  %2686 = vmatprep.subr.bf16.mxu1 %v3820_v40  ;;  %v3901_v39 = vld [vmem:[#allocation9 + $0x4e4] ss:$16 sps:$4 sm:$0xff]   ;;  %v3904_v40 = vld [vmem:[#allocation9 + $0x4ec] ss:$16 sps:$4 sm:$0xff]  }
 0x281   :  { %2515 = vmatpush1.bf16.msra.mxu0 %v3815_v41  ;;  %2687 = vmatpush1.bf16.msra.mxu1 %v3818_v42  ;;  %v3899_v41 = vld [vmem:[#allocation9 + $0x4e0] ss:$16 sps:$4 sm:$0xff]   ;;  %v3902_v42 = vld [vmem:[#allocation9 + $0x4e8] ss:$16 sps:$4 sm:$0xff]  }
 0x282   :  { %2516 = vmatprep.subr.bf16.mxu0 %v3823_v43  ;;  %2688 = vmatprep.subr.bf16.mxu1 %v3826_v44  ;;  %v3907_v43 = vld [vmem:[#allocation9 + $0x504] ss:$16 sps:$4 sm:$0xff]   ;;  %v3910_v44 = vld [vmem:[#allocation9 + $0x50c] ss:$16 sps:$4 sm:$0xff]  }
 0x285   :  { %2517 = vmatpush1.bf16.msra.mxu0 %v3821_v45  ;;  %2689 = vmatpush1.bf16.msra.mxu1 %v3824_v46  ;;  %v3905_v45 = vld [vmem:[#allocation9 + $0x500] ss:$16 sps:$4 sm:$0xff]   ;;  %v3908_v46 = vld [vmem:[#allocation9 + $0x508] ss:$16 sps:$4 sm:$0xff]  }
 0x286   :  { %2518 = vmatprep.subr.bf16.mxu0 %v3829_v47  ;;  %2690 = vmatprep.subr.bf16.mxu1 %v3832_v48  ;;  %v3913_v47 = vld [vmem:[#allocation9 + $0x524] ss:$16 sps:$4 sm:$0xff]   ;;  %v3916_v48 = vld [vmem:[#allocation9 + $0x52c] ss:$16 sps:$4 sm:$0xff]  }
 0x289   :  { %2519 = vmatpush1.bf16.msra.mxu0 %v3827_v49  ;;  %2691 = vmatpush1.bf16.msra.mxu1 %v3830_v50  ;;  %v3911_v49 = vld [vmem:[#allocation9 + $0x520] ss:$16 sps:$4 sm:$0xff]   ;;  %v3914_v50 = vld [vmem:[#allocation9 + $0x528] ss:$16 sps:$4 sm:$0xff]  }
 0x28a   :  { %2520 = vmatprep.subr.bf16.mxu0 %v3835_v51  ;;  %2692 = vmatprep.subr.bf16.mxu1 %v3838_v52  ;;  %v3919_v51 = vld [vmem:[#allocation9 + $0x544] ss:$16 sps:$4 sm:$0xff]   ;;  %v3922_v52 = vld [vmem:[#allocation9 + $0x54c] ss:$16 sps:$4 sm:$0xff]  }
 0x28d   :  { %2521 = vmatpush1.bf16.msra.mxu0 %v3833_v56  ;;  %2693 = vmatpush1.bf16.msra.mxu1 %v3836_v57  ;;  %v3917_v56 = vld [vmem:[#allocation9 + $0x540] ss:$16 sps:$4 sm:$0xff]   ;;  %v3920_v57 = vld [vmem:[#allocation9 + $0x548] ss:$16 sps:$4 sm:$0xff]  }
 0x28e   :  { %2522 = vmatprep.subr.bf16.mxu0 %v3841_v58  ;;  %2694 = vmatprep.subr.bf16.mxu1 %v3844_v59  ;;  %v3925_v58 = vld [vmem:[#allocation9 + $0x564] ss:$16 sps:$4 sm:$0xff]   ;;  %v3928_v59 = vld [vmem:[#allocation9 + $0x56c] ss:$16 sps:$4 sm:$0xff]  }
 0x291   :  { %2523 = vmatpush1.bf16.msra.mxu0 %v3839_v60  ;;  %2695 = vmatpush1.bf16.msra.mxu1 %v3842_v62  ;;  %v3923_v60 = vld [vmem:[#allocation9 + $0x560] ss:$16 sps:$4 sm:$0xff]   ;;  %v3926_v62 = vld [vmem:[#allocation9 + $0x568] ss:$16 sps:$4 sm:$0xff]  }
 0x292   :  { %2524 = vmatprep.subr.bf16.mxu0 %v3847_v63  ;;  %2696 = vmatprep.subr.bf16.mxu1 %v3850_v1  ;;  %v3931_v63 = vld [vmem:[#allocation9 + $0x584] ss:$16 sps:$4 sm:$0xff]   ;;  %v3934_v1 = vld [vmem:[#allocation9 + $0x58c] ss:$16 sps:$4 sm:$0xff]  }
 0x295   :  { %2525 = vmatpush1.bf16.msra.mxu0 %v3845_v3  ;;  %2697 = vmatpush1.bf16.msra.mxu1 %v3848_v4  ;;  %v3929_v3 = vld [vmem:[#allocation9 + $0x580] ss:$16 sps:$4 sm:$0xff]   ;;  %v3932_v4 = vld [vmem:[#allocation9 + $0x588] ss:$16 sps:$4 sm:$0xff]  }
 0x296   :  { %2526 = vmatprep.subr.bf16.mxu0 %v3853_v7  ;;  %2698 = vmatprep.subr.bf16.mxu1 %v3856_v10  ;;  %v3937_v7 = vld [vmem:[#allocation9 + $0x5a4] ss:$16 sps:$4 sm:$0xff]   ;;  %v3940_v10 = vld [vmem:[#allocation9 + $0x5ac] ss:$16 sps:$4 sm:$0xff]  }
 0x299   :  { %2527 = vmatpush1.bf16.msra.mxu0 %v3851_v8  ;;  %2699 = vmatpush1.bf16.msra.mxu1 %v3854_v9  ;;  %v3935_v8 = vld [vmem:[#allocation9 + $0x5a0] ss:$16 sps:$4 sm:$0xff]   ;;  %v3938_v9 = vld [vmem:[#allocation9 + $0x5a8] ss:$16 sps:$4 sm:$0xff]  }
 0x29a   :  { %2539 = vmatprep.subr.bf16.mxu0 %v3859_v11  ;;  %2711 = vmatprep.subr.bf16.mxu1 %v3862_v12  ;;  %v3943_v11 = vld [vmem:[#allocation9 + $0x5c4] ss:$16 sps:$4 sm:$0xff]   ;;  %v3946_v12 = vld [vmem:[#allocation9 + $0x5cc] ss:$16 sps:$4 sm:$0xff]  }
 0x29c   :  { %2529 = vmatmul.mubr.bf16.vlgmr.msra.gmra.mrb[4].mxu0 %v4441_v37  ;;  %2701 = vmatmul.mubr.bf16.vlgmr.msra.gmra.mrb[16].mxu1 %v4441_v37  ;;  %v3880_v37 = vld [vmem:[#allocation9 + $0x46c] ss:$16 sps:$4 sm:$0xff]  }
 0x29d   :  { %2540 = vmatpush1.bf16.msra.mxu0 %v3857_v13  ;;  %2571 = vmatprep.mubr.bf16.mxu0 %v4449_v6  ;;  %v3941_v13 = vld [vmem:[#allocation9 + $0x5c0] ss:$16 sps:$4 sm:$0xff]  }
 0x29e   :  { %2712 = vmatpush1.bf16.msra.mxu1 %v3860_v14  ;;  %2743 = vmatprep.mubr.bf16.mxu1 %v4449_v6  ;;  %v3886_v6 = vld [vmem:[#allocation9 + $0x48c] ss:$16 sps:$4 sm:$0xff]   ;;  %v3944_v14 = vld [vmem:[#allocation9 + $0x5c8] ss:$16 sps:$4 sm:$0xff]  }
 0x29f   :  { %2541 = vmatprep.subr.bf16.mxu0 %v3865_v16  ;;  %2713 = vmatprep.subr.bf16.mxu1 %v3868_v17  ;;  %v3949_v16 = vld [vmem:[#allocation9 + $0x5e4] ss:$16 sps:$4 sm:$0xff]   ;;  %v3952_v17 = vld [vmem:[#allocation9 + $0x5ec] ss:$16 sps:$4 sm:$0xff]  }
 0x2a1   :  { %2542 = vmatpush1.bf16.msra.mxu0 %v3863_v18  ;;  %v3947_v18 = vld [vmem:[#allocation9 + $0x5e0] ss:$16 sps:$4 sm:$0xff]  }
 0x2a2   :  { %2714 = vmatpush1.bf16.msra.mxu1 %v3866_v54  ;;  %2543 = vmatprep.subr.bf16.mxu0 %v3871_v19  ;;  %v3950_v54 = vld [vmem:[#allocation9 + $0x5e8] ss:$16 sps:$4 sm:$0xff]   ;;  %v3955_v19 = vld [vmem:[#allocation9 + $0x604] ss:$16 sps:$4 sm:$0xff]  }
 0x2a3   :  { %2715 = vmatprep.subr.bf16.mxu1 %v3874_v20  ;;  %v3958_v20 = vld [vmem:[#allocation9 + $0x60c] ss:$16 sps:$4 sm:$0xff]  }
 0x2a5   :  { %2544 = vmatpush1.bf16.msra.mxu0 %v3869_v21  ;;  %v3953_v21 = vld [vmem:[#allocation9 + $0x600] ss:$16 sps:$4 sm:$0xff]  }
 0x2a6   :  { %2716 = vmatpush1.bf16.msra.mxu1 %v3872_v22  ;;  %2545 = vmatprep.subr.bf16.mxu0 %v3877_v23  ;;  %v3956_v22 = vld [vmem:[#allocation9 + $0x608] ss:$16 sps:$4 sm:$0xff]   ;;  %v3961_v23 = vld [vmem:[#allocation9 + $0x624] ss:$16 sps:$4 sm:$0xff]  }
 0x2a7   :  { %2717 = vmatprep.subr.bf16.mxu1 %v3880_v37  ;;  %v3964_v37 = vld [vmem:[#allocation9 + $0x62c] ss:$16 sps:$4 sm:$0xff]  }
 0x2a9   :  { %2546 = vmatpush1.bf16.msra.mxu0 %v3875_v15  ;;  %v3959_v15 = vld [vmem:[#allocation9 + $0x620] ss:$16 sps:$4 sm:$0xff]  }
 0x2aa   :  { %2718 = vmatpush1.bf16.msra.mxu1 %v3878_v24  ;;  %2547 = vmatprep.subr.bf16.mxu0 %v3883_v25  ;;  %v3962_v24 = vld [vmem:[#allocation9 + $0x628] ss:$16 sps:$4 sm:$0xff]   ;;  %v3967_v25 = vld [vmem:[#allocation9 + $0x644] ss:$16 sps:$4 sm:$0xff]  }
 0x2ab   :  { %2719 = vmatprep.subr.bf16.mxu1 %v3886_v6  ;;  %v3970_v6 = vld [vmem:[#allocation9 + $0x64c] ss:$16 sps:$4 sm:$0xff]  }
 0x2ad   :  { %2548 = vmatpush1.bf16.msra.mxu0 %v3881_v28  ;;  %v3965_v28 = vld [vmem:[#allocation9 + $0x640] ss:$16 sps:$4 sm:$0xff]  }
 0x2ae   :  { %2720 = vmatpush1.bf16.msra.mxu1 %v3884_v29  ;;  %2549 = vmatprep.subr.bf16.mxu0 %v3889_v30  ;;  %v3968_v29 = vld [vmem:[#allocation9 + $0x648] ss:$16 sps:$4 sm:$0xff]   ;;  %v3973_v30 = vld [vmem:[#allocation9 + $0x664] ss:$16 sps:$4 sm:$0xff]  }
 0x2af   :  { %2721 = vmatprep.subr.bf16.mxu1 %v3892_v31  ;;  %v3971_v31 = vld [vmem:[#allocation9 + $0x660] ss:$16 sps:$4 sm:$0xff]  }
 0x2b1   :  { %2550 = vmatpush1.bf16.msra.mxu0 %v3887_v32  ;;  %v3974_v32 = vld [vmem:[#allocation9 + $0x668] ss:$16 sps:$4 sm:$0xff]  }
 0x2b2   :  { %2722 = vmatpush1.bf16.msra.mxu1 %v3890_v33  ;;  %2551 = vmatprep.subr.bf16.mxu0 %v3895_v34  ;;  %v3979_v33 = vld [vmem:[#allocation9 + $0x684] ss:$16 sps:$4 sm:$0xff]   ;;  %v3982_v34 = vld [vmem:[#allocation9 + $0x68c] ss:$16 sps:$4 sm:$0xff]  }
 0x2b3   :  { %2723 = vmatprep.subr.bf16.mxu1 %v3898_v35  ;;  %v3980_v35 = vld [vmem:[#allocation9 + $0x688] ss:$16 sps:$4 sm:$0xff]  }
 0x2b5   :  { %2552 = vmatpush1.bf16.msra.mxu0 %v3893_v36  ;;  %v3985_v36 = vld [vmem:[#allocation9 + $0x6a4] ss:$16 sps:$4 sm:$0xff]  }
 0x2b6   :  { %2724 = vmatpush1.bf16.msra.mxu1 %v3896_v38  ;;  %2553 = vmatprep.subr.bf16.mxu0 %v3901_v39  ;;  %v3988_v38 = vld [vmem:[#allocation9 + $0x6ac] ss:$16 sps:$4 sm:$0xff]   ;;  %v3983_v39 = vld [vmem:[#allocation9 + $0x6a0] ss:$16 sps:$4 sm:$0xff]  }
 0x2b7   :  { %2725 = vmatprep.subr.bf16.mxu1 %v3904_v40  ;;  %v3986_v40 = vld [vmem:[#allocation9 + $0x6a8] ss:$16 sps:$4 sm:$0xff]  }
 0x2b9   :  { %2554 = vmatpush1.bf16.msra.mxu0 %v3899_v41  ;;  %v3991_v41 = vld [vmem:[#allocation9 + $0x6c4] ss:$16 sps:$4 sm:$0xff]  }
 0x2ba   :  { %2726 = vmatpush1.bf16.msra.mxu1 %v3902_v42  ;;  %2555 = vmatprep.subr.bf16.mxu0 %v3907_v43  ;;  %v3994_v42 = vld [vmem:[#allocation9 + $0x6cc] ss:$16 sps:$4 sm:$0xff]   ;;  %v3989_v43 = vld [vmem:[#allocation9 + $0x6c0] ss:$16 sps:$4 sm:$0xff]  }
 0x2bb   :  { %2727 = vmatprep.subr.bf16.mxu1 %v3910_v44  ;;  %v3992_v44 = vld [vmem:[#allocation9 + $0x6c8] ss:$16 sps:$4 sm:$0xff]  }
 0x2bd   :  { %2556 = vmatpush1.bf16.msra.mxu0 %v3905_v45  ;;  %v3997_v45 = vld [vmem:[#allocation9 + $0x6e4] ss:$16 sps:$4 sm:$0xff]  }
 0x2be   :  { %2728 = vmatpush1.bf16.msra.mxu1 %v3908_v46  ;;  %2557 = vmatprep.subr.bf16.mxu0 %v3913_v47  ;;  %v4000_v46 = vld [vmem:[#allocation9 + $0x6ec] ss:$16 sps:$4 sm:$0xff]   ;;  %v3995_v47 = vld [vmem:[#allocation9 + $0x6e0] ss:$16 sps:$4 sm:$0xff]  }
 0x2bf   :  { %2729 = vmatprep.subr.bf16.mxu1 %v3916_v48  ;;  %v3998_v48 = vld [vmem:[#allocation9 + $0x6e8] ss:$16 sps:$4 sm:$0xff]  }
 0x2c1   :  { %2558 = vmatpush1.bf16.msra.mxu0 %v3911_v49  ;;  %v4003_v49 = vld [vmem:[#allocation9 + $0x704] ss:$16 sps:$4 sm:$0xff]  }
 0x2c2   :  { %2730 = vmatpush1.bf16.msra.mxu1 %v3914_v50  ;;  %2559 = vmatprep.subr.bf16.mxu0 %v3919_v51  ;;  %v4006_v50 = vld [vmem:[#allocation9 + $0x70c] ss:$16 sps:$4 sm:$0xff]   ;;  %v4001_v51 = vld [vmem:[#allocation9 + $0x700] ss:$16 sps:$4 sm:$0xff]  }
 0x2c3   :  { %2731 = vmatprep.subr.bf16.mxu1 %v3922_v52  ;;  %v4004_v52 = vld [vmem:[#allocation9 + $0x708] ss:$16 sps:$4 sm:$0xff]  }
 0x2c5   :  { %2560 = vmatpush1.bf16.msra.mxu0 %v3917_v56  ;;  %v4009_v56 = vld [vmem:[#allocation9 + $0x724] ss:$16 sps:$4 sm:$0xff]  }
 0x2c6   :  { %2732 = vmatpush1.bf16.msra.mxu1 %v3920_v57  ;;  %2561 = vmatprep.subr.bf16.mxu0 %v3925_v58  ;;  %v4012_v57 = vld [vmem:[#allocation9 + $0x72c] ss:$16 sps:$4 sm:$0xff]   ;;  %v4007_v58 = vld [vmem:[#allocation9 + $0x720] ss:$16 sps:$4 sm:$0xff]  }
 0x2c7   :  { %2733 = vmatprep.subr.bf16.mxu1 %v3928_v59  ;;  %v4010_v59 = vld [vmem:[#allocation9 + $0x728] ss:$16 sps:$4 sm:$0xff]  }
 0x2c9   :  { %2562 = vmatpush1.bf16.msra.mxu0 %v3923_v60  ;;  %v4015_v60 = vld [vmem:[#allocation9 + $0x744] ss:$16 sps:$4 sm:$0xff]  }
 0x2ca   :  { %2734 = vmatpush1.bf16.msra.mxu1 %v3926_v62  ;;  %2563 = vmatprep.subr.bf16.mxu0 %v3931_v63  ;;  %v4018_v62 = vld [vmem:[#allocation9 + $0x74c] ss:$16 sps:$4 sm:$0xff]   ;;  %v4013_v63 = vld [vmem:[#allocation9 + $0x740] ss:$16 sps:$4 sm:$0xff]  }
 0x2cb   :  { %2735 = vmatprep.subr.bf16.mxu1 %v3934_v1  ;;  %v4016_v1 = vld [vmem:[#allocation9 + $0x748] ss:$16 sps:$4 sm:$0xff]  }
 0x2cd   :  { %2564 = vmatpush1.bf16.msra.mxu0 %v3929_v3  ;;  %v4021_v3 = vld [vmem:[#allocation9 + $0x764] ss:$16 sps:$4 sm:$0xff]  }
 0x2ce   :  { %2736 = vmatpush1.bf16.msra.mxu1 %v3932_v4  ;;  %2565 = vmatprep.subr.bf16.mxu0 %v3937_v7  ;;  %v4024_v4 = vld [vmem:[#allocation9 + $0x76c] ss:$16 sps:$4 sm:$0xff]   ;;  %v4019_v7 = vld [vmem:[#allocation9 + $0x760] ss:$16 sps:$4 sm:$0xff]  }
 0x2cf   :  { %2737 = vmatprep.subr.bf16.mxu1 %v3940_v10  ;;  %v4022_v10 = vld [vmem:[#allocation9 + $0x768] ss:$16 sps:$4 sm:$0xff]  }
 0x2d1   :  { %2566 = vmatpush1.bf16.msra.mxu0 %v3935_v8  ;;  %v4027_v8 = vld [vmem:[#allocation9 + $0x784] ss:$16 sps:$4 sm:$0xff]  }
 0x2d2   :  { %2738 = vmatpush1.bf16.msra.mxu1 %v3938_v9  ;;  %2567 = vmatprep.subr.bf16.mxu0 %v3943_v11  ;;  %v4030_v9 = vld [vmem:[#allocation9 + $0x78c] ss:$16 sps:$4 sm:$0xff]   ;;  %v4025_v11 = vld [vmem:[#allocation9 + $0x780] ss:$16 sps:$4 sm:$0xff]  }
 0x2d3   :  { %2739 = vmatprep.subr.bf16.mxu1 %v3946_v12  ;;  %v4028_v12 = vld [vmem:[#allocation9 + $0x788] ss:$16 sps:$4 sm:$0xff]  }
 0x2d5   :  { %2568 = vmatpush1.bf16.msra.mxu0 %v3941_v13  ;;  %v4033_v13 = vld [vmem:[#allocation9 + $0x7a4] ss:$16 sps:$4 sm:$0xff]  }
 0x2d6   :  { %2740 = vmatpush1.bf16.msra.mxu1 %v3944_v14  ;;  %2569 = vmatprep.subr.bf16.mxu0 %v3949_v16  ;;  %v4036_v14 = vld [vmem:[#allocation9 + $0x7ac] ss:$16 sps:$4 sm:$0xff]   ;;  %v4031_v16 = vld [vmem:[#allocation9 + $0x7a0] ss:$16 sps:$4 sm:$0xff]  }
 0x2d7   :  { %2741 = vmatprep.subr.bf16.mxu1 %v3952_v17  ;;  %v4034_v17 = vld [vmem:[#allocation9 + $0x7a8] ss:$16 sps:$4 sm:$0xff]  }
 0x2d9   :  { %2570 = vmatpush1.bf16.msra.mxu0 %v3947_v18  ;;  %v4039_v18 = vld [vmem:[#allocation9 + $0x7c4] ss:$16 sps:$4 sm:$0xff]  }
 0x2da   :  { %2742 = vmatpush1.bf16.msra.mxu1 %v3950_v54  ;;  %2582 = vmatprep.subr.bf16.mxu0 %v3955_v19  ;;  %v4042_v54 = vld [vmem:[#allocation9 + $0x7cc] ss:$16 sps:$4 sm:$0xff]   ;;  %v4037_v19 = vld [vmem:[#allocation9 + $0x7c0] ss:$16 sps:$4 sm:$0xff]  }
 0x2db   :  { %2754 = vmatprep.subr.bf16.mxu1 %v3958_v20  ;;  %v4040_v20 = vld [vmem:[#allocation9 + $0x7c8] ss:$16 sps:$4 sm:$0xff]  }
 0x2dc   :  { %2572 = vmatmul.mubr.bf16.vlgmr.msra.gmra.mrb[4].mxu0 %v4447_v5 }
 0x2dd   :  { %2744 = vmatmul.mubr.bf16.vlgmr.msra.gmra.mrb[16].mxu1 %v4447_v5  ;;  %2583 = vmatpush1.bf16.msra.mxu0 %v3953_v21  ;;  %v3976_v5 = vld [vmem:[#allocation9 + $0x66c] ss:$16 sps:$4 sm:$0xff]   ;;  %v4045_v21 = vld [vmem:[#allocation9 + $0x7e4] ss:$16 sps:$4 sm:$0xff]  }
 0x2de   :  { %2614 = vmatprep.mubr.bf16.mxu0 %v4453_v27  ;;  %2755 = vmatpush1.bf16.msra.mxu1 %v3956_v22  ;;  %v4048_v22 = vld [vmem:[#allocation9 + $0x7ec] ss:$16 sps:$4 sm:$0xff]  }
 0x2df   :  { %2786 = vmatprep.mubr.bf16.mxu1 %v4453_v27  ;;  %2584 = vmatprep.subr.bf16.mxu0 %v3961_v23  ;;  %v3977_v27 = vld [vmem:[#allocation9 + $0x680] ss:$16 sps:$4 sm:$0xff]  }
 0x2e0   :  { %2756 = vmatprep.subr.bf16.mxu1 %v3964_v37  ;;  %v4043_v23 = vld [vmem:[#allocation9 + $0x7e0] ss:$16 sps:$4 sm:$0xff]   ;;  %v4046_v37 = vld [vmem:[#allocation9 + $0x7e8] ss:$16 sps:$4 sm:$0xff]  }
 0x2e1   :  { %2585 = vmatpush1.bf16.msra.mxu0 %v3959_v15  ;;  %v4049_v15 = vld [vmem:[#allocation10 + $0x40] sm:$0xff]  }
 0x2e2   :  { %2757 = vmatpush1.bf16.msra.mxu1 %v3962_v24  ;;  %2586 = vmatprep.subr.bf16.mxu0 %v3967_v25  ;;  %v4050_v24 = vld [vmem:[#allocation10] sm:$0xff]   ;;  %v4051_v25 = vld [vmem:[#allocation10 + $0x48] sm:$0xff]  }
 0x2e3   :  { %2758 = vmatprep.subr.bf16.mxu1 %v3970_v6  ;;  %v4052_v6 = vld [vmem:[#allocation10 + $0x8] sm:$0xff]  }
 0x2e5   :  { %2587 = vmatpush1.bf16.msra.mxu0 %v3965_v28  ;;  %v4053_v28 = vld [vmem:[#allocation10 + $0x50] sm:$0xff]  }
 0x2e6   :  { %2759 = vmatpush1.bf16.msra.mxu1 %v3968_v29  ;;  %2588 = vmatprep.subr.bf16.mxu0 %v3973_v30  ;;  %v4054_v29 = vld [vmem:[#allocation10 + $0x10] sm:$0xff]   ;;  %v4055_v30 = vld [vmem:[#allocation10 + $0x58] sm:$0xff]  }
 0x2e7   :  { %2760 = vmatprep.subr.bf16.mxu1 %v3976_v5  ;;  %v4056_v5 = vld [vmem:[#allocation10 + $0x18] sm:$0xff]  }
 0x2e9   :  { %2589 = vmatpush1.bf16.msra.mxu0 %v3971_v31  ;;  %v4057_v31 = vld [vmem:[#allocation10 + $0x60] sm:$0xff]  }
 0x2ea   :  { %2761 = vmatpush1.bf16.msra.mxu1 %v3974_v32  ;;  %2590 = vmatprep.subr.bf16.mxu0 %v3979_v33  ;;  %v4058_v32 = vld [vmem:[#allocation10 + $0x20] sm:$0xff]   ;;  %v4059_v33 = vld [vmem:[#allocation10 + $0x68] sm:$0xff]  }
 0x2eb   :  { %2762 = vmatprep.subr.bf16.mxu1 %v3982_v34  ;;  %v4060_v34 = vld [vmem:[#allocation10 + $0x28] sm:$0xff]  }
 0x2ed   :  { %2591 = vmatpush1.bf16.msra.mxu0 %v3977_v27  ;;  %v4062_v27 = vld [vmem:[#allocation10 + $0x30] sm:$0xff]  }
 0x2ee   :  { %2763 = vmatpush1.bf16.msra.mxu1 %v3980_v35  ;;  %2592 = vmatprep.subr.bf16.mxu0 %v3985_v36  ;;  %v4063_v35 = vld [vmem:[#allocation10 + $0x78] sm:$0xff]  }
 0x2ef   :  { %2764 = vmatprep.subr.bf16.mxu1 %v3988_v38  ;;  %v4064_v36 = vld [vmem:[#allocation10 + $0x38] sm:$0xff]   ;;  %v4065_v38 = vld [vmem:[#allocation10 + $0xc0] sm:$0xff]  }
 0x2f1   :  { %2593 = vmatpush1.bf16.msra.mxu0 %v3983_v39  ;;  %v1151_v39 = vld [vmem:[%s4498_s7] sm:$0xf] }
 0x2f2   :  { %2765 = vmatpush1.bf16.msra.mxu1 %v3986_v40  ;;  %2594 = vmatprep.subr.bf16.mxu0 %v3991_v41  ;;  %v1156_v40 = vrot.slane %v1151_v39, %v817_v53  ;;  %v1164_v41 = vrot.slane %v1151_v39, %v825_v61 }
 0x2f3   :  { %2766 = vmatprep.subr.bf16.mxu1 %v3994_v42  ;;  %v1160_v42 = vrot.slane %v1151_v39, %v821_v55 }
 0x2f5   :  { %2595 = vmatpush1.bf16.msra.mxu0 %v3989_v43  ;;  %v1168_v43 = vrot.slane %v1151_v39, %v829_v0 }
 0x2f6   :  { %2767 = vmatpush1.bf16.msra.mxu1 %v3992_v44  ;;  %2596 = vmatprep.subr.bf16.mxu0 %v3997_v45 }
 0x2f7   :  { %2768 = vmatprep.subr.bf16.mxu1 %v4000_v46 }
 0x2f9   :  { %2597 = vmatpush1.bf16.msra.mxu0 %v3995_v47 }
 0x2fa   :  { %2769 = vmatpush1.bf16.msra.mxu1 %v3998_v48  ;;  %2598 = vmatprep.subr.bf16.mxu0 %v4003_v49 }
 0x2fb   :  { %2770 = vmatprep.subr.bf16.mxu1 %v4006_v50 }
 0x2fd   :  { %2599 = vmatpush1.bf16.msra.mxu0 %v4001_v51 }
 0x2fe   :  { %2771 = vmatpush1.bf16.msra.mxu1 %v4004_v52  ;;  %2600 = vmatprep.subr.bf16.mxu0 %v4009_v56 }
 0x2ff   :  { %2772 = vmatprep.subr.bf16.mxu1 %v4012_v57 }
 0x301   :  { %2601 = vmatpush1.bf16.msra.mxu0 %v4007_v58 }
 0x302   :  { %2773 = vmatpush1.bf16.msra.mxu1 %v4010_v59  ;;  %2602 = vmatprep.subr.bf16.mxu0 %v4015_v60 }
 0x303   :  { %2774 = vmatprep.subr.bf16.mxu1 %v4018_v62 }
 0x305   :  { %2603 = vmatpush1.bf16.msra.mxu0 %v4013_v63 }
 0x306   :  { %2775 = vmatpush1.bf16.msra.mxu1 %v4016_v1  ;;  %2604 = vmatprep.subr.bf16.mxu0 %v4021_v3 }
 0x307   :  { %2776 = vmatprep.subr.bf16.mxu1 %v4024_v4 }
 0x309   :  { %2605 = vmatpush1.bf16.msra.mxu0 %v4019_v7 }
 0x30a   :  { %2777 = vmatpush1.bf16.msra.mxu1 %v4022_v10  ;;  %2606 = vmatprep.subr.bf16.mxu0 %v4027_v8 }
 0x30b   :  { %2778 = vmatprep.subr.bf16.mxu1 %v4030_v9  ;;  %v4066_v9 = vld [vmem:[#allocation10 + $0x80] sm:$0xff]  }
 0x30d   :  { %2607 = vmatpush1.bf16.msra.mxu0 %v4025_v11 }
 0x30e   :  { %2779 = vmatpush1.bf16.msra.mxu1 %v4028_v12  ;;  %2608 = vmatprep.subr.bf16.mxu0 %v4033_v13  ;;  %v4067_v12 = vld [vmem:[#allocation10 + $0xc8] sm:$0xff]  }
 0x30f   :  { %2780 = vmatprep.subr.bf16.mxu1 %v4036_v14  ;;  %v4068_v13 = vld [vmem:[#allocation10 + $0x88] sm:$0xff]   ;;  %v4069_v14 = vld [vmem:[#allocation10 + $0xd0] sm:$0xff]  }
 0x311   :  { %2609 = vmatpush1.bf16.msra.mxu0 %v4031_v16  ;;  %v4070_v16 = vld [vmem:[#allocation10 + $0x90] sm:$0xff]  }
 0x312   :  { %2781 = vmatpush1.bf16.msra.mxu1 %v4034_v17  ;;  %2610 = vmatprep.subr.bf16.mxu0 %v4039_v18  ;;  %v4071_v17 = vld [vmem:[#allocation10 + $0xd8] sm:$0xff]  }
 0x313   :  { %2782 = vmatprep.subr.bf16.mxu1 %v4042_v54  ;;  %v4072_v18 = vld [vmem:[#allocation10 + $0x98] sm:$0xff]   ;;  %v4073_v54 = vld [vmem:[#allocation10 + $0xe0] sm:$0xff]  }
 0x315   :  { %2611 = vmatpush1.bf16.msra.mxu0 %v4037_v19  ;;  %v4074_v19 = vld [vmem:[#allocation10 + $0xa0] sm:$0xff]  }
 0x316   :  { %2783 = vmatpush1.bf16.msra.mxu1 %v4040_v20  ;;  %2612 = vmatprep.subr.bf16.mxu0 %v4045_v21  ;;  %v4075_v20 = vld [vmem:[#allocation10 + $0xe8] sm:$0xff]  }
 0x317   :  { %2784 = vmatprep.subr.bf16.mxu1 %v4048_v22  ;;  %v4076_v21 = vld [vmem:[#allocation10 + $0xa8] sm:$0xff]   ;;  %v4077_v22 = vld [vmem:[#allocation10 + $0xf0] sm:$0xff]  }
 0x319   :  { %2613 = vmatpush1.bf16.msra.mxu0 %v4043_v23  ;;  %v4078_v23 = vld [vmem:[#allocation10 + $0xb0] sm:$0xff]  }
 0x31a   :  { %2785 = vmatpush1.bf16.msra.mxu1 %v4046_v37  ;;  %3526 = vmatprep.subr.bf16.mxu0 %v4049_v15  ;;  %v4079_v37 = vld [vmem:[#allocation10 + $0xf8] sm:$0xff]  }
 0x31b   :  { %v4080_v15 = vld [vmem:[#allocation10 + $0xb8] sm:$0xff]  }
 0x31c   :  { %2615 = vmatmul.mubr.bf16.vlgmr.msra.gmra.mrb[4].mxu0 %v4451_v26 }
 0x31d   :  { %2787 = vmatmul.mubr.bf16.vlgmr.msra.gmra.mrb[16].mxu1 %v4451_v26  ;;  %3527 = vmatpush3.bf16.msra.mxu0 %v4050_v24  ;;  %v4061_v26 = vld [vmem:[#allocation10 + $0x70] sm:$0xff]  }
 0x31e   :  { %3528 = vmatprep.subr.bf16.mxu0 %v4051_v25 }
 0x321   :  { %3529 = vmatpush3.bf16.msra.mxu0 %v4052_v6 }
 0x322   :  { %3530 = vmatprep.subr.bf16.mxu0 %v4053_v28 }
 0x325   :  { %3531 = vmatpush3.bf16.msra.mxu0 %v4054_v29 }
 0x326   :  { %3532 = vmatprep.subr.bf16.mxu0 %v4055_v30 }
 0x329   :  { %3533 = vmatpush3.bf16.msra.mxu0 %v4056_v5  ;;  %v3484_v5 = vld [vmem:[%s4500_s9] ss:$0 sm:$0xff] }
 0x32a   :  { %3534 = vmatprep.subr.bf16.mxu0 %v4057_v31 }
 0x32d   :  { %3535 = vmatpush3.bf16.msra.mxu0 %v4058_v32 }
 0x32e   :  { %3536 = vmatprep.subr.bf16.mxu0 %v4059_v33 }
 0x331   :  { %3537 = vmatpush3.bf16.msra.mxu0 %v4060_v34 }
 0x332   :  { %3538 = vmatprep.subr.bf16.mxu0 %v4061_v26 }
 0x335   :  { %3539 = vmatpush3.bf16.msra.mxu0 %v4062_v27 }
 0x336   :  { %3540 = vmatprep.subr.bf16.mxu0 %v4063_v35 }
 0x339   :  { %3541 = vmatpush3.bf16.msra.mxu0 %v4064_v36 }
 0x33a   :  { %3548 = vmatprep.subr.bf16.mxu0 %v4065_v38 }
 0x3ef   :  { %v2616_v44 = vpop.f32.mrb[4].mxu0 }
 0x3f0   :  { %v3590_v45 = vadd.f32 %v2616_v44, %v1156_v40  ;;  %v2788_v46 = vpop.f32.mrb[16].mxu1  ;;  %v2618_v47 = vpop.f32.mrb[5].mxu0 }
 0x3f1   :  { %v3594_v48 = vadd.f32 %v2788_v46, %v1164_v41  ;;  %v3591_v49 = vadd.f32 %v2618_v47, %v1160_v42  ;;  %v2790_v50 = vpop.f32.mrb[17].mxu1  ;;  %v2620_v51 = vpop.f32.mrb[6].mxu0 }
 0x3f2   :  { %v3595_v52 = vadd.f32 %v2790_v50, %v1168_v43  ;;  %v3592_v56 = vadd.f32 %v2620_v51, %v1156_v40  ;;  %v2792_v53 = vpop.f32.mrb[18].mxu1  ;;  %v2622_v57 = vpop.f32.mrb[7].mxu0  ;;  %v2797_v60 = vmax.f32 %v3590_v45, 0.0 }
 0x3f3   :  { %v3596_v58 = vadd.f32 %v2792_v53, %v1164_v41  ;;  %v3593_v61 = vadd.f32 %v2622_v57, %v1160_v42  ;;  %v2794_v59 = vpop.f32.mrb[19].mxu1  ;;  %v2799_v2 = vmax.f32 %v3594_v48, 0.0  ;;  %v2798_v0 = vmax.f32 %v3591_v49, 0.0 }
 0x3f4   :  { %v2801_v55 = vmax.f32 %v3592_v56, 0.0  ;;  %v3597_v62 = vadd.f32 %v2794_v59, %v1168_v43  ;;  %v2800_v3 = vmax.f32 %v3595_v52, 0.0 }
 0x3f5   :  { %v2803_v63 = vmax.f32 %v3596_v58, 0.0  ;;  %v2802_v1 = vmax.f32 %v3593_v61, 0.0 }
 0x3f6   :  { %v2805_v4 = vpack.c.bf16 %v2801_v55, %v2797_v60  ;;  %v2804_v7 = vmax.f32 %v3597_v62, 0.0 }
 0x3f7   :  { %v2807_v10 = vpack.c.bf16 %v2803_v63, %v2799_v2  ;;  %v2806_v8 = vpack.c.bf16 %v2802_v1, %v2798_v0 }
 0x3f8   :  { %v2808_v11 = vpack.c.bf16 %v2804_v7, %v2800_v3 }
 0x3f9   :  { %3104 = vmatprep.mubr.bf16.mxu0 %v2806_v8 }
 0x3fa   :  { %3105 = vmatmul.mubr.bf16.vlgmr.msra.gmra.mrb[8].mxu0 %v2805_v4 }
 0x3fb   :  { %3549 = vmatpush3.bf16.msra.mxu0 %v4066_v9  ;;  %3145 = vmatprep.mubr.bf16.mxu0 %v2808_v11 }
 0x3fc   :  { %3550 = vmatprep.subr.bf16.mxu0 %v4067_v12 }
 0x3ff   :  { %3551 = vmatpush3.bf16.msra.mxu0 %v4068_v13 }
 0x400   :  { %3552 = vmatprep.subr.bf16.mxu0 %v4069_v14 }
 0x403   :  { %3553 = vmatpush3.bf16.msra.mxu0 %v4070_v16 }
 0x404   :  { %3554 = vmatprep.subr.bf16.mxu0 %v4071_v17 }
 0x407   :  { %3555 = vmatpush3.bf16.msra.mxu0 %v4072_v18 }
 0x408   :  { %3556 = vmatprep.subr.bf16.mxu0 %v4073_v54 }
 0x40b   :  { %3557 = vmatpush3.bf16.msra.mxu0 %v4074_v19 }
 0x40c   :  { %3558 = vmatprep.subr.bf16.mxu0 %v4075_v20 }
 0x40f   :  { %3559 = vmatpush3.bf16.msra.mxu0 %v4076_v21 }
 0x410   :  { %3560 = vmatprep.subr.bf16.mxu0 %v4077_v22 }
 0x413   :  { %3561 = vmatpush3.bf16.msra.mxu0 %v4078_v23 }
 0x414   :  { %3562 = vmatprep.subr.bf16.mxu0 %v4079_v37 }
 0x417   :  { %3563 = vmatpush3.bf16.msra.mxu0 %v4080_v15 }
 0x41a   :  { %3146 = vmatmul.mubr.bf16.vlgmr.msra.gmra.mrb[12].mxu0 %v2807_v10 }
 0x4cd   :  { %v3542_v24 = vpop.f32.mrb[8].mxu0 }
 0x4ce   :  { %v3543_v25 = vpop.f32.mrb[9].mxu0 }
 0x4cf   :  { %v3544_v6 = vadd.f32 %v3543_v25, %v3542_v24  ;;  %v3545_v28 = vpop.f32.mrb[10].mxu0 }
 0x4d0   :  { %v3546_v29 = vpop.f32.mrb[11].mxu0 }
 0x4d1   :  { %v3547_v30 = vadd.f32 %v3546_v29, %v3545_v28  ;;  %v3107_v33 = vadd.f32 %v3544_v6, %v3484_v5 }
 0x4d3   :  { %v3110_v35 = vadd.f32 %v3547_v30, %v3484_v5 }
 0x4ed   :  { %v3564_v31 = vpop.f32.mrb[12].mxu0 }
 0x4ee   :  { %v3565_v32 = vpop.f32.mrb[13].mxu0 }
 0x4ef   :  { %v3566_v34 = vadd.f32 %v3565_v32, %v3564_v31  ;;  %v3567_v26 = vpop.f32.mrb[14].mxu0 }
 0x4f0   :  { %v3568_v27 = vpop.f32.mrb[15].mxu0 }
 0x4f1   :  { %v3148_v36 = vadd.f32 %v3566_v34, %v3107_v33  ;;  %v3569_v38 = vadd.f32 %v3568_v27, %v3567_v26 }
 0x4f3   :  { %3154 = vst [vmem:[#allocation12] sm:$0xff] %v3148_v36  ;;  %v3151_v39 = vadd.f32 %v3569_v38, %v3110_v35 }
 0x4f5   :  { %3155 = vst [vmem:[#allocation12 + $0x8] sm:$0xff] %v3151_v39 }
 0x4f6   :  { %4184 = shalt.err (!%p4181_p8)
}
 0x4f7   :  { %s4185_s28 = scalar_lea.hbm %s4501_s10, 256 }
 0x4f8   :  { %p4186_p9 = scmp.ne.s32.totalorder %s4501_s10, %s4185_s28  ;;  %p4189_p10 = scmp.lt.u32.totalorder %s4185_s28, %s4501_s10 }
 0x4fa   :  { %p4191_p11 = pnand %p4189_p10, %p4186_p9 }
 0x4fc   :  { %4194 = shalt.err (!%p4191_p11)
}
 0x4fd   :  { %s4218_s16 = smov 128   ;;  %s4219_s25 = smov 8  }
 0x4fe   :  { %3167 = dma.vmem_to_hbm [thread:$0]  %s3162_s8, 256, %s4501_s10, [#allocation6], %s4218_s16, %s4218_s16, %s4219_s25  }
 0x4ff   :  { %4201 = dma.done.wait [#allocation6], 256  }
 0x500   :  { %4202 = vsyncadd [#allocation6], 4294967040 }
 0x501   :  { %3171 = vsyncpa [#allocation5], 1 }
 0x502   :  { %3172 = vsyncpa [#allocation8], 1 }
 0x503   :  { %3173 = vsyncpa [#allocation11], 1 }
 0x504   :  { %3174 = vsyncpa [#allocation6], 1 }

</bundles_post_ra>
